<compile_context>
chip_gen: v5e
topology: v5e:2x2
jax: 0.10.0
libtpu: 0.0.40
codegen_flags: <defaults>
</compile_context>

<pallas_src>
import functools

import jax
import jax.numpy as jnp
from jax.experimental import pallas as pl
from jax.experimental.pallas import tpu as pltpu

EMB = 300        # word embedding dim (fixed by the module)
H = 128          # opt.num_hid (lane-aligned)
VDIM = 2048      # visual feature dim (fixed by the module)
NANS = 3129      # answer vocabulary (fixed by the module)
NANS_PAD = 3200  # 25 * 128: lane-dense classifier output, sliced back in the wrapper


def _round_up(x, m):
    return ((x + m - 1) // m) * m


def _vmem_capacity_bytes():
    """Physical VMEM of the current chip; conservative (v7x-sized) fallback."""
    try:
        cap = getattr(pltpu.get_tpu_info(), "vmem_capacity_bytes", None)
        if cap:
            return int(cap)
    except Exception:
        pass
    return 64 << 20


# -----------------------------------------------------------------------------
# GRU kernel: batch-tiled grid.  Per tile, the input-to-hidden projection for
# every timestep is one big bf16 MXU matmul (with r/z hidden biases pre-folded);
# the recurrence is an unrolled in-kernel loop over a VMEM scratch.
# PyTorch gate order (r, z, n) and n = tanh(gi_n + r*(gh_n + b_hn)) are exact.
# -----------------------------------------------------------------------------
def gru_kernel(x_ref, wih_ref, whh_ref, bfold_ref, bhn_ref, h_out_ref, gi_scr):
    S, TBG, E = x_ref.shape

    # Hoisted input projection: [S*TBG, EMB] @ [EMB, 3H] in bf16, f32 accumulation.
    # (TBG is a multiple of 8, so collapsing (S, TBG) is a layout no-op.)
    x2d = x_ref[...].reshape(S * TBG, E)
    gi_scr[...] = (
        jnp.dot(x2d, wih_ref[...], preferred_element_type=jnp.float32)
        + bfold_ref[...])

    whh = whh_ref[...]          # [H, 3H] bf16
    bhn = bhn_ref[...]          # [1, H]  f32

    def step(t, h):
        off = pl.multiple_of(t * TBG, 8)
        gi = gi_scr[pl.ds(off, TBG), :]                               # [TBG, 3H] f32
        gh = jnp.dot(h.astype(jnp.bfloat16), whh,
                     preferred_element_type=jnp.float32)              # [TBG, 3H] f32
        r = jax.nn.sigmoid(gi[:, 0 * H:1 * H] + gh[:, 0 * H:1 * H])
        z = jax.nn.sigmoid(gi[:, 1 * H:2 * H] + gh[:, 1 * H:2 * H])
        n = jnp.tanh(gi[:, 2 * H:3 * H] + r * (gh[:, 2 * H:3 * H] + bhn))
        return (1.0 - z) * n + z * h

    h = jax.lax.fori_loop(0, S, step, jnp.zeros((TBG, H), jnp.float32),
                          unroll=True)
    h_out_ref[...] = h


def _pick_gru_tb(bp):
    for cand in (64, 32, 16, 8):
        if bp % cand == 0 and (cand < bp or bp == 8):
            return cand
    return 8


def question_gru(x_tm, pk):
    """x_tm: time-major bf16 embeddings [S, Bp, EMB] -> final hidden [Bp, H] f32."""
    S, Bp, E = x_tm.shape
    TBG = _pick_gru_tb(Bp)
    return pl.pallas_call(
        gru_kernel,
        out_shape=jax.ShapeDtypeStruct((Bp, H), jnp.float32),
        grid=(Bp // TBG,),
        in_specs=[
            pl.BlockSpec((S, TBG, E), lambda b: (0, b, 0)),
            pl.BlockSpec((E, 3 * H), lambda b: (0, 0)),
            pl.BlockSpec((H, 3 * H), lambda b: (0, 0)),
            pl.BlockSpec((1, 3 * H), lambda b: (0, 0)),
            pl.BlockSpec((1, H), lambda b: (0, 0)),
        ],
        out_specs=pl.BlockSpec((TBG, H), lambda b: (b, 0)),
        scratch_shapes=[pltpu.VMEM((S * TBG, 3 * H), jnp.float32)],
        compiler_params=pltpu.CompilerParams(
            dimension_semantics=("parallel",)),
    )(x_tm, pk["wih"], pk["whh"], pk["bfold"], pk["bhn"])


# -----------------------------------------------------------------------------
# Fused head kernel: both Att_3 heads in one packed projection, attention
# pooling (bf16 batched matmul), q_net / gv_net, joint product, 2-layer
# classifier.  Batch-tiled grid; weights resident (constant index_map); all
# MXU inputs bf16 with f32 accumulation; gv tile cast to bf16 in VMEM.
# -----------------------------------------------------------------------------
def head_kernel(gv_ref, q_ref,
                att_wv_ref, att_bv_ref, wq_ref, bq_ref,
                wl_ref, bl1_ref, bl2_ref,
                gn_w_ref, gn_b_ref, c1_w_ref, c1_b_ref,
                c2_w_ref, c2_b_ref,
                att_ref, logits_ref, *, k_valid):
    TB, Kp, V = gv_ref.shape
    gv = gv_ref[...].astype(jnp.bfloat16)               # [TB, Kp, V] cast once in VMEM
    q = q_ref[...].astype(jnp.bfloat16)                 # [TB, H]

    # Fused v-projection for both attention heads: one [TB*Kp, V] x [V, 2H] pass.
    vp = jnp.maximum(
        jnp.dot(gv.reshape(TB * Kp, V), att_wv_ref[...],
                preferred_element_type=jnp.float32)
        + att_bv_ref[...], 0.0).reshape(TB, Kp, 2 * H)   # relu(v_proj), heads packed

    # Fused q-side projections: a1_wq | a2_wq | qn_w  ->  [TB, 3H]
    qp = jnp.maximum(
        jnp.dot(q, wq_ref[...], preferred_element_type=jnp.float32)
        + bq_ref[...], 0.0)
    q_repr = qp[:, 2 * H:]                              # q_net output  [TB, H]

    # Attention logits: scale q-side by wl once, then contract over H.
    qw = qp[:, :2 * H] * wl_ref[...]                    # [TB, 2H]
    joint = vp * qw[:, None, :]                         # [TB, Kp, 2H]
    logit1 = jnp.sum(joint[:, :, :H], axis=-1) + bl1_ref[...]
    logit2 = jnp.sum(joint[:, :, H:], axis=-1) + bl2_ref[...]
    if k_valid != Kp:
        # Padded (zero) regions must not take softmax mass.
        kmask = jax.lax.broadcasted_iota(jnp.int32, (TB, Kp), 1) < k_valid
        neg = jnp.float32(-1e30)
        logit1 = jnp.where(kmask, logit1, neg)
        logit2 = jnp.where(kmask, logit2, neg)
    att_gv = jax.nn.softmax(logit1, axis=-1) + jax.nn.softmax(logit2, axis=-1)
    att_ref[...] = att_gv                               # [TB, Kp]

    # Attention-weighted pooling over regions: bf16 batched matmul, f32 accumulation
    # (streams through the MXU; avoids a TB*Kp*V f32 VPU temp).
    gv_emb = jnp.einsum(
        "bqk,bkv->bqv", att_gv.astype(jnp.bfloat16)[:, None, :], gv,
        preferred_element_type=jnp.float32)[:, 0]       # [TB, V] f32

    gv_repr = jnp.maximum(
        jnp.dot(gv_emb.astype(jnp.bfloat16), gn_w_ref[...],
                preferred_element_type=jnp.float32) + gn_b_ref[...], 0.0)
    joint_repr = q_repr * gv_repr                       # [TB, H] f32

    hid = jnp.maximum(
        jnp.dot(joint_repr.astype(jnp.bfloat16), c1_w_ref[...],
                preferred_element_type=jnp.float32)
        + c1_b_ref[...], 0.0)                           # [TB, 2H]
    logits_ref[...] = (
        jnp.dot(hid.astype(jnp.bfloat16), c2_w_ref[...],
                preferred_element_type=jnp.float32) + c2_b_ref[...])


def _head_vmem_plan(bp, kp):
    """Pick (batch tile TB, vmem_limit_bytes) from the chip's physical VMEM."""
    phys = _vmem_capacity_bytes()
    limit = int(min(phys, 128 << 20)) * 3 // 4          # explicit scoped-VMEM budget
    budget = int(limit * 0.9)
    # Resident weights (double-buffered allocation, conservative).
    weights = 2 * (VDIM * 2 * H * 2      # att_wv bf16
                   + VDIM * H * 2        # gn_w bf16
                   + 2 * H * NANS_PAD * 2  # c2_w bf16
                   + H * 3 * H * 2 + H * 2 * H * 2) + (1 << 20)
    tb = 8
    for cand in (64, 32, 16, 8):
        if bp % cand or (cand >= bp and bp > 8):
            continue                                     # keep >= 2 grid steps (v7x)
        tile = (2 * cand * kp * VDIM * 4                 # gv f32 block, double-buffered
                + cand * kp * VDIM * 2                   # in-kernel bf16 copy of gv
                + 2 * cand * kp * 2 * H * 4              # vp + joint temps
                + 2 * cand * NANS_PAD * 4                # logits out, double-buffered
                + 2 * cand * kp * 4                      # att out
                + cand * VDIM * 4                        # gv_emb
                + (2 << 20))                             # slack for small temps
        if weights + tile <= budget:
            tb = cand
            break
    return tb, limit


def updn_head(gv_p, q_emb_p, pk, k_valid):
    Bp, Kp, V = gv_p.shape
    TB, vmem_limit = _head_vmem_plan(Bp, Kp)

    def wspec(*shape):
        n = len(shape)
        return pl.BlockSpec(shape, lambda b, _n=n: (0,) * _n)

    # TODO(synk): if a profile shows exposed gv DMA on v5e/v6e, bump the gv spec
    # to pipeline_mode=pl.Buffered(3) (keep 2-deep on v7x's 64 MiB VMEM).
    att, logits = pl.pallas_call(
        functools.partial(head_kernel, k_valid=k_valid),
        out_shape=(jax.ShapeDtypeStruct((Bp, Kp), jnp.float32),
                   jax.ShapeDtypeStruct((Bp, NANS_PAD), jnp.float32)),
        grid=(Bp // TB,),
        in_specs=[
            pl.BlockSpec((TB, Kp, V), lambda b: (b, 0, 0)),
            pl.BlockSpec((TB, H), lambda b: (b, 0)),
            wspec(VDIM, 2 * H), wspec(1, 2 * H),
            wspec(H, 3 * H), wspec(1, 3 * H),
            wspec(1, 2 * H), wspec(1, 1), wspec(1, 1),
            wspec(VDIM, H), wspec(1, H),
            wspec(H, 2 * H), wspec(1, 2 * H),
            wspec(2 * H, NANS_PAD), wspec(1, NANS_PAD),
        ],
        out_specs=(pl.BlockSpec((TB, Kp), lambda b: (b, 0)),
                   pl.BlockSpec((TB, NANS_PAD), lambda b: (b, 0))),
        compiler_params=pltpu.CompilerParams(
            dimension_semantics=("parallel",),
            vmem_limit_bytes=vmem_limit),
    )(gv_p, q_emb_p,
      pk["att_wv"], pk["att_bv"], pk["wq"], pk["bq"],
      pk["wl"], pk["bl1"], pk["bl2"],
      pk["gn_w"], pk["gn_b"], pk["c1_w"], pk["c1_b"],
      pk["c2_w"], pk["c2_b"])
    return att, logits


# -----------------------------------------------------------------------------
# Full UpDn forward (glue + kernels)
# -----------------------------------------------------------------------------
def updn_forward(pk, q_tokens, gv):
    B, S = q_tokens.shape
    K = gv.shape[1]

    # WordEmbedding (gather is glue; padding row is all-zero; dropout = eval id).
    w_emb = pk["emb"][q_tokens]                                    # [B, S, 300] f32

    # Pad batch to a sublane multiple (>= 8).  Tokens are padded (cheap); gv is only
    # padded when B or K are not already 8-aligned (otherwise it is passed untouched,
    # avoiding an extra HBM pass over the dominant tensor).
    Bp = _round_up(B, 8)
    Kp = _round_up(K, 8)
    q_tok_p = jnp.pad(q_tokens, ((0, Bp - B), (0, 0)))             # padded rows sliced later

    # Time-major bf16 gather straight into GRU layout (no transpose / cast pass).
    x_tm = pk["emb_bf16"][q_tok_p.T]                               # [S, Bp, 300] bf16

    # QuestionEmbedding (GRU, last timestep hidden)
    q_emb_p = question_gru(x_tm, pk)                               # [Bp, H] f32

    gv_p = gv
    if Bp != B or Kp != K:
        gv_p = jnp.pad(gv, ((0, Bp - B), (0, Kp - K), (0, 0)))     # stays f32

    # Attention x2 + pooling + q_net/gv_net + classifier (fused Pallas kernel)
    att_p, logits_p = updn_head(gv_p, q_emb_p, pk, k_valid=K)      # [Bp,Kp],[Bp,3200]

    logits = logits_p[:B, :NANS]
    att_gv = att_p[:B, :K]

    # TODO(synk): argsort (descending) has no clean Pallas TPU equivalent; plain JAX.
    ansidx = jnp.argsort(-logits, axis=1)

    return w_emb, logits, att_gv[:, :, None], ansidx


# -----------------------------------------------------------------------------
# Parameters: raw (module-structured) + packed (kernel-ready) forms
# -----------------------------------------------------------------------------
def make_params(key, ntokens):
    keys = list(jax.random.split(key, 32))
    it = iter(keys)

    def U(shape, fan_in):
        s = float(fan_in) ** -0.5
        return jax.random.uniform(next(it), shape, jnp.float32, -s, s)

    emb = 0.1 * jax.random.normal(next(it), (ntokens + 1, EMB), jnp.float32)
    emb = emb.at[ntokens].set(0.0)                       # padding_idx = ntokens

    p = {
        "emb": emb,
        # GRU (PyTorch gate order r, z, n), stored as [in, 3H] / [H, 3H]
        "gru_wih": U((EMB, 3 * H), H), "gru_whh": U((H, 3 * H), H),
        "gru_bih": U((1, 3 * H), H),   "gru_bhh": U((1, 3 * H), H),
    }
    for a in ("a1", "a2"):           # two Att_3 heads
        p[f"{a}_wv"] = U((VDIM, H), VDIM)
        p[f"{a}_bv"] = U((1, H), VDIM)
        p[f"{a}_wq"] = U((H, H), H)
        p[f"{a}_bq"] = U((1, H), H)
        p[f"{a}_wl"] = U((1, H), H)   # Linear(num_hid, 1) weight, row vector
        p[f"{a}_bl"] = U((1, 1), H)
    p["qn_w"] = U((H, H), H);        p["qn_b"] = U((1, H), H)          # q_net
    p["gn_w"] = U((VDIM, H), VDIM);  p["gn_b"] = U((1, H), VDIM)       # gv_net
    p["c1_w"] = U((H, 2 * H), H);    p["c1_b"] = U((1, 2 * H), H)      # classifier
    p["c2_w"] = U((2 * H, NANS), 2 * H)
    p["c2_b"] = U((1, NANS), 2 * H)
    return p


def pack_params(p):
    """Fold/concat/pad/cast weights into kernel-ready form (done once, wrapper-side)."""
    # GRU: fold b_ih + (b_hh for r,z gates) into one bias added with the hoisted matmul;
    # keep b_hh of the n gate separate (needed inside r * (gh_n + b_hn)).
    bfold = p["gru_bih"] + jnp.concatenate(
        [p["gru_bhh"][:, :2 * H], jnp.zeros((1, H), jnp.float32)], axis=1)
    return {
        "emb": p["emb"],
        "emb_bf16": p["emb"].astype(jnp.bfloat16),       # GRU-side gather table
        "wih": p["gru_wih"].astype(jnp.bfloat16),
        "whh": p["gru_whh"].astype(jnp.bfloat16),
        "bfold": bfold, "bhn": p["gru_bhh"][:, 2 * H:],
        # both attention heads packed side by side (one 256-wide MXU pass over gv)
        "att_wv": jnp.concatenate([p["a1_wv"], p["a2_wv"]], axis=1).astype(jnp.bfloat16),
        "att_bv": jnp.concatenate([p["a1_bv"], p["a2_bv"]], axis=1),
        # a1_wq | a2_wq | qn_w packed into one [H, 3H] matmul
        "wq": jnp.concatenate([p["a1_wq"], p["a2_wq"], p["qn_w"]],
                              axis=1).astype(jnp.bfloat16),
        "bq": jnp.concatenate([p["a1_bq"], p["a2_bq"], p["qn_b"]], axis=1),
        "wl": jnp.concatenate([p["a1_wl"], p["a2_wl"]], axis=1),
        "bl1": p["a1_bl"], "bl2": p["a2_bl"],
        "gn_w": p["gn_w"].astype(jnp.bfloat16), "gn_b": p["gn_b"],
        "c1_w": p["c1_w"].astype(jnp.bfloat16), "c1_b": p["c1_b"],
        # classifier output padded to a lane multiple (3129 -> 3200), sliced back later
        "c2_w": jnp.pad(p["c2_w"], ((0, 0), (0, NANS_PAD - NANS))).astype(jnp.bfloat16),
        "c2_b": jnp.pad(p["c2_b"], ((0, 0), (0, NANS_PAD - NANS))),
    }


if __name__ == "__main__":
    B, S, K = 2, 8, 8          # batch, question length, # visual regions
    NTOKENS = 50

    key = jax.random.PRNGKey(0)
    kp, kq, kg = jax.random.split(key, 3)
    params = pack_params(make_params(kp, NTOKENS))

    q = jax.random.randint(kq, (B, S), 0, NTOKENS, dtype=jnp.int32)
    gv = jax.random.normal(kg, (B, K, VDIM), jnp.float32)

    w_emb, logits, att_gv, ansidx = updn_forward(params, q, gv)
    jax.block_until_ready((w_emb, logits, att_gv, ansidx))

    assert w_emb.shape == (B, S, EMB)
    assert logits.shape == (B, NANS)
    assert att_gv.shape == (B, K, 1)
    assert ansidx.shape == (B, NANS)
    assert jnp.all(jnp.isfinite(logits))
    # each Att_3 softmax sums to 1 over regions => att_1 + att_2 sums to 2
    assert jnp.allclose(jnp.sum(att_gv, axis=1), 2.0, atol=1e-3)

    print("KERNEL_OK")
</pallas_src>

<mosaic_0001>
module attributes {stable_mosaic.version = 11 : i64} {
  func.func @gru_kernel(%arg0: i32, %arg1: memref<8x8x300xbf16, #tpu.memory_space<vmem>>, %arg2: memref<300x384xbf16, #tpu.memory_space<vmem>>, %arg3: memref<128x384xbf16, #tpu.memory_space<vmem>>, %arg4: memref<1x384xf32, #tpu.memory_space<vmem>>, %arg5: memref<1x128xf32, #tpu.memory_space<vmem>>, %arg6: memref<8x128xf32, #tpu.memory_space<vmem>>, %arg7: memref<64x384xf32, #tpu.memory_space<vmem>>) attributes {dimension_semantics = [#tpu.dimension_semantics<parallel>], iteration_bounds = array<i64: 1>, scalar_prefetch = 0 : i64, scratch_operands = 1 : i64, tpu.core_type = #tpu.core_type<tc>, window_params = [{transform_indices = @transform_0, window_bounds = array<i64: 8, 8, 300>}, {pipeline_mode = #tpu.pipeline_mode<synchronous>, transform_indices = @transform_1, window_bounds = array<i64: 300, 384>}, {pipeline_mode = #tpu.pipeline_mode<synchronous>, transform_indices = @transform_2, window_bounds = array<i64: 128, 384>}, {pipeline_mode = #tpu.pipeline_mode<synchronous>, transform_indices = @transform_3, window_bounds = array<i64: 1, 384>}, {pipeline_mode = #tpu.pipeline_mode<synchronous>, transform_indices = @transform_4, window_bounds = array<i64: 1, 128>}, {transform_indices = @transform_5, window_bounds = array<i64: 8, 128>}]} {
    %c0 = arith.constant 0 : index
    %c0_0 = arith.constant 0 : index
    %c0_1 = arith.constant 0 : index
    %0 = vector.load %arg1[%c0, %c0_0, %c0_1] : memref<8x8x300xbf16, #tpu.memory_space<vmem>>, vector<8x8x300xbf16>
    %1 = vector.shape_cast %0 : vector<8x8x300xbf16> to vector<64x300xbf16>
    %c0_2 = arith.constant 0 : index
    %c0_3 = arith.constant 0 : index
    %2 = vector.load %arg2[%c0_2, %c0_3] : memref<300x384xbf16, #tpu.memory_space<vmem>>, vector<300x384xbf16>
    %cst = arith.constant dense<0.000000e+00> : vector<64x384xf32>
    %3 = tpu.matmul %1, %2, %cst {dimension_numbers = #tpu.dot_dimension_numbers<[1], [0], [0], [1], [0, 0, 1, 1], [], []>} : vector<64x300xbf16>, vector<300x384xbf16>, vector<64x384xf32> -> vector<64x384xf32>
    %c0_4 = arith.constant 0 : index
    %c0_5 = arith.constant 0 : index
    %4 = vector.load %arg4[%c0_4, %c0_5] : memref<1x384xf32, #tpu.memory_space<vmem>>, vector<1x384xf32>
    %5 = vector.broadcast %4 : vector<1x384xf32> to vector<64x384xf32>
    %6 = arith.addf %3, %5 : vector<64x384xf32>
    %c0_6 = arith.constant 0 : index
    %c0_7 = arith.constant 0 : index
    %7 = vector.load %arg7[%c0_6, %c0_7] : memref<64x384xf32, #tpu.memory_space<vmem>>, vector<64x384xf32>
    tpu.vector_store %arg7[%c0_6, %c0_7], %6 {strides = array<i32>} : memref<64x384xf32, #tpu.memory_space<vmem>>, vector<64x384xf32>,
    %c0_8 = arith.constant 0 : index
    %c0_9 = arith.constant 0 : index
    %8 = vector.load %arg3[%c0_8, %c0_9] : memref<128x384xbf16, #tpu.memory_space<vmem>>, vector<128x384xbf16>
    %c0_10 = arith.constant 0 : index
    %c0_11 = arith.constant 0 : index
    %9 = vector.load %arg5[%c0_10, %c0_11] : memref<1x128xf32, #tpu.memory_space<vmem>>, vector<1x128xf32>
    %cst_12 = arith.constant 0.000000e+00 : f32
    %10 = vector.broadcast %cst_12 : f32 to vector<8x128xf32>
    %c0_i32 = arith.constant 0 : i32
    %c8_i32 = arith.constant 8 : i32
    %11 = arith.muli %c0_i32, %c8_i32 : i32
    %12 = tpu.assume_multiple %11, 8 : i32
    %13 = arith.index_cast %12 : i32 to index
    %c0_13 = arith.constant 0 : index
    %14 = vector.load %arg7[%13, %c0_13] : memref<64x384xf32, #tpu.memory_space<vmem>>, vector<8x384xf32>
    %15 = arith.truncf %10 : vector<8x128xf32> to vector<8x128xbf16>
    %cst_14 = arith.constant dense<0.000000e+00> : vector<8x384xf32>
    %16 = tpu.matmul %15, %8, %cst_14 {dimension_numbers = #tpu.dot_dimension_numbers<[1], [0], [0], [1], [0, 0, 1, 1], [], []>} : vector<8x128xbf16>, vector<128x384xbf16>, vector<8x384xf32> -> vector<8x384xf32>
    %17 = vector.extract_strided_slice %14 {offsets = [0, 0], sizes = [8, 128], strides = [1, 1]} : vector<8x384xf32> to vector<8x128xf32>
    %18 = vector.extract_strided_slice %16 {offsets = [0, 0], sizes = [8, 128], strides = [1, 1]} : vector<8x384xf32> to vector<8x128xf32>
    %19 = arith.addf %17, %18 : vector<8x128xf32>
    %20 = arith.negf %19 : vector<8x128xf32>
    %21 = math.exp %20 : vector<8x128xf32>
    %cst_15 = arith.constant 1.000000e+00 : f32
    %22 = vector.broadcast %cst_15 : f32 to vector<8x128xf32>
    %23 = arith.addf %22, %21 : vector<8x128xf32>
    %24 = arith.divf %22, %23 : vector<8x128xf32>
    %25 = vector.extract_strided_slice %14 {offsets = [0, 128], sizes = [8, 128], strides = [1, 1]} : vector<8x384xf32> to vector<8x128xf32>
    %26 = vector.extract_strided_slice %16 {offsets = [0, 128], sizes = [8, 128], strides = [1, 1]} : vector<8x384xf32> to vector<8x128xf32>
    %27 = arith.addf %25, %26 : vector<8x128xf32>
    %28 = arith.negf %27 : vector<8x128xf32>
    %29 = math.exp %28 : vector<8x128xf32>
    %cst_16 = arith.constant 1.000000e+00 : f32
    %30 = vector.broadcast %cst_16 : f32 to vector<8x128xf32>
    %31 = arith.addf %30, %29 : vector<8x128xf32>
    %32 = arith.divf %30, %31 : vector<8x128xf32>
    %33 = vector.extract_strided_slice %14 {offsets = [0, 256], sizes = [8, 128], strides = [1, 1]} : vector<8x384xf32> to vector<8x128xf32>
    %34 = vector.extract_strided_slice %16 {offsets = [0, 256], sizes = [8, 128], strides = [1, 1]} : vector<8x384xf32> to vector<8x128xf32>
    %35 = vector.broadcast %9 : vector<1x128xf32> to vector<8x128xf32>
    %36 = arith.addf %34, %35 : vector<8x128xf32>
    %37 = arith.mulf %24, %36 : vector<8x128xf32>
    %38 = arith.addf %33, %37 : vector<8x128xf32>
    %39 = math.tanh %38 : vector<8x128xf32>
    %cst_17 = arith.constant 1.000000e+00 : f32
    %40 = vector.broadcast %cst_17 : f32 to vector<8x128xf32>
    %41 = arith.subf %40, %32 : vector<8x128xf32>
    %42 = arith.mulf %41, %39 : vector<8x128xf32>
    %43 = arith.mulf %32, %10 : vector<8x128xf32>
    %44 = arith.addf %42, %43 : vector<8x128xf32>
    %c1_i32 = arith.constant 1 : i32
    %c8_i32_18 = arith.constant 8 : i32
    %45 = arith.muli %c1_i32, %c8_i32_18 : i32
    %46 = tpu.assume_multiple %45, 8 : i32
    %47 = arith.index_cast %46 : i32 to index
    %c0_19 = arith.constant 0 : index
    %48 = vector.load %arg7[%47, %c0_19] : memref<64x384xf32, #tpu.memory_space<vmem>>, vector<8x384xf32>
    %49 = arith.truncf %44 : vector<8x128xf32> to vector<8x128xbf16>
    %cst_20 = arith.constant dense<0.000000e+00> : vector<8x384xf32>
    %50 = tpu.matmul %49, %8, %cst_20 {dimension_numbers = #tpu.dot_dimension_numbers<[1], [0], [0], [1], [0, 0, 1, 1], [], []>} : vector<8x128xbf16>, vector<128x384xbf16>, vector<8x384xf32> -> vector<8x384xf32>
    %51 = vector.extract_strided_slice %48 {offsets = [0, 0], sizes = [8, 128], strides = [1, 1]} : vector<8x384xf32> to vector<8x128xf32>
    %52 = vector.extract_strided_slice %50 {offsets = [0, 0], sizes = [8, 128], strides = [1, 1]} : vector<8x384xf32> to vector<8x128xf32>
    %53 = arith.addf %51, %52 : vector<8x128xf32>
    %54 = arith.negf %53 : vector<8x128xf32>
    %55 = math.exp %54 : vector<8x128xf32>
    %cst_21 = arith.constant 1.000000e+00 : f32
    %56 = vector.broadcast %cst_21 : f32 to vector<8x128xf32>
    %57 = arith.addf %56, %55 : vector<8x128xf32>
    %58 = arith.divf %56, %57 : vector<8x128xf32>
    %59 = vector.extract_strided_slice %48 {offsets = [0, 128], sizes = [8, 128], strides = [1, 1]} : vector<8x384xf32> to vector<8x128xf32>
    %60 = vector.extract_strided_slice %50 {offsets = [0, 128], sizes = [8, 128], strides = [1, 1]} : vector<8x384xf32> to vector<8x128xf32>
    %61 = arith.addf %59, %60 : vector<8x128xf32>
    %62 = arith.negf %61 : vector<8x128xf32>
    %63 = math.exp %62 : vector<8x128xf32>
    %cst_22 = arith.constant 1.000000e+00 : f32
    %64 = vector.broadcast %cst_22 : f32 to vector<8x128xf32>
    %65 = arith.addf %64, %63 : vector<8x128xf32>
    %66 = arith.divf %64, %65 : vector<8x128xf32>
    %67 = vector.extract_strided_slice %48 {offsets = [0, 256], sizes = [8, 128], strides = [1, 1]} : vector<8x384xf32> to vector<8x128xf32>
    %68 = vector.extract_strided_slice %50 {offsets = [0, 256], sizes = [8, 128], strides = [1, 1]} : vector<8x384xf32> to vector<8x128xf32>
    %69 = vector.broadcast %9 : vector<1x128xf32> to vector<8x128xf32>
    %70 = arith.addf %68, %69 : vector<8x128xf32>
    %71 = arith.mulf %58, %70 : vector<8x128xf32>
    %72 = arith.addf %67, %71 : vector<8x128xf32>
    %73 = math.tanh %72 : vector<8x128xf32>
    %cst_23 = arith.constant 1.000000e+00 : f32
    %74 = vector.broadcast %cst_23 : f32 to vector<8x128xf32>
    %75 = arith.subf %74, %66 : vector<8x128xf32>
    %76 = arith.mulf %75, %73 : vector<8x128xf32>
    %77 = arith.mulf %66, %44 : vector<8x128xf32>
    %78 = arith.addf %76, %77 : vector<8x128xf32>
    %c2_i32 = arith.constant 2 : i32
    %c8_i32_24 = arith.constant 8 : i32
    %79 = arith.muli %c2_i32, %c8_i32_24 : i32
    %80 = tpu.assume_multiple %79, 8 : i32
    %81 = arith.index_cast %80 : i32 to index
    %c0_25 = arith.constant 0 : index
    %82 = vector.load %arg7[%81, %c0_25] : memref<64x384xf32, #tpu.memory_space<vmem>>, vector<8x384xf32>
    %83 = arith.truncf %78 : vector<8x128xf32> to vector<8x128xbf16>
    %cst_26 = arith.constant dense<0.000000e+00> : vector<8x384xf32>
    %84 = tpu.matmul %83, %8, %cst_26 {dimension_numbers = #tpu.dot_dimension_numbers<[1], [0], [0], [1], [0, 0, 1, 1], [], []>} : vector<8x128xbf16>, vector<128x384xbf16>, vector<8x384xf32> -> vector<8x384xf32>
    %85 = vector.extract_strided_slice %82 {offsets = [0, 0], sizes = [8, 128], strides = [1, 1]} : vector<8x384xf32> to vector<8x128xf32>
    %86 = vector.extract_strided_slice %84 {offsets = [0, 0], sizes = [8, 128], strides = [1, 1]} : vector<8x384xf32> to vector<8x128xf32>
    %87 = arith.addf %85, %86 : vector<8x128xf32>
    %88 = arith.negf %87 : vector<8x128xf32>
    %89 = math.exp %88 : vector<8x128xf32>
    %cst_27 = arith.constant 1.000000e+00 : f32
    %90 = vector.broadcast %cst_27 : f32 to vector<8x128xf32>
    %91 = arith.addf %90, %89 : vector<8x128xf32>
    %92 = arith.divf %90, %91 : vector<8x128xf32>
    %93 = vector.extract_strided_slice %82 {offsets = [0, 128], sizes = [8, 128], strides = [1, 1]} : vector<8x384xf32> to vector<8x128xf32>
    %94 = vector.extract_strided_slice %84 {offsets = [0, 128], sizes = [8, 128], strides = [1, 1]} : vector<8x384xf32> to vector<8x128xf32>
    %95 = arith.addf %93, %94 : vector<8x128xf32>
    %96 = arith.negf %95 : vector<8x128xf32>
    %97 = math.exp %96 : vector<8x128xf32>
    %cst_28 = arith.constant 1.000000e+00 : f32
    %98 = vector.broadcast %cst_28 : f32 to vector<8x128xf32>
    %99 = arith.addf %98, %97 : vector<8x128xf32>
    %100 = arith.divf %98, %99 : vector<8x128xf32>
    %101 = vector.extract_strided_slice %82 {offsets = [0, 256], sizes = [8, 128], strides = [1, 1]} : vector<8x384xf32> to vector<8x128xf32>
    %102 = vector.extract_strided_slice %84 {offsets = [0, 256], sizes = [8, 128], strides = [1, 1]} : vector<8x384xf32> to vector<8x128xf32>
    %103 = vector.broadcast %9 : vector<1x128xf32> to vector<8x128xf32>
    %104 = arith.addf %102, %103 : vector<8x128xf32>
    %105 = arith.mulf %92, %104 : vector<8x128xf32>
    %106 = arith.addf %101, %105 : vector<8x128xf32>
    %107 = math.tanh %106 : vector<8x128xf32>
    %cst_29 = arith.constant 1.000000e+00 : f32
    %108 = vector.broadcast %cst_29 : f32 to vector<8x128xf32>
    %109 = arith.subf %108, %100 : vector<8x128xf32>
    %110 = arith.mulf %109, %107 : vector<8x128xf32>
    %111 = arith.mulf %100, %78 : vector<8x128xf32>
    %112 = arith.addf %110, %111 : vector<8x128xf32>
    %c3_i32 = arith.constant 3 : i32
    %c8_i32_30 = arith.constant 8 : i32
    %113 = arith.muli %c3_i32, %c8_i32_30 : i32
    %114 = tpu.assume_multiple %113, 8 : i32
    %115 = arith.index_cast %114 : i32 to index
    %c0_31 = arith.constant 0 : index
    %116 = vector.load %arg7[%115, %c0_31] : memref<64x384xf32, #tpu.memory_space<vmem>>, vector<8x384xf32>
    %117 = arith.truncf %112 : vector<8x128xf32> to vector<8x128xbf16>
    %cst_32 = arith.constant dense<0.000000e+00> : vector<8x384xf32>
    %118 = tpu.matmul %117, %8, %cst_32 {dimension_numbers = #tpu.dot_dimension_numbers<[1], [0], [0], [1], [0, 0, 1, 1], [], []>} : vector<8x128xbf16>, vector<128x384xbf16>, vector<8x384xf32> -> vector<8x384xf32>
    %119 = vector.extract_strided_slice %116 {offsets = [0, 0], sizes = [8, 128], strides = [1, 1]} : vector<8x384xf32> to vector<8x128xf32>
    %120 = vector.extract_strided_slice %118 {offsets = [0, 0], sizes = [8, 128], strides = [1, 1]} : vector<8x384xf32> to vector<8x128xf32>
    %121 = arith.addf %119, %120 : vector<8x128xf32>
    %122 = arith.negf %121 : vector<8x128xf32>
    %123 = math.exp %122 : vector<8x128xf32>
    %cst_33 = arith.constant 1.000000e+00 : f32
    %124 = vector.broadcast %cst_33 : f32 to vector<8x128xf32>
    %125 = arith.addf %124, %123 : vector<8x128xf32>
    %126 = arith.divf %124, %125 : vector<8x128xf32>
    %127 = vector.extract_strided_slice %116 {offsets = [0, 128], sizes = [8, 128], strides = [1, 1]} : vector<8x384xf32> to vector<8x128xf32>
    %128 = vector.extract_strided_slice %118 {offsets = [0, 128], sizes = [8, 128], strides = [1, 1]} : vector<8x384xf32> to vector<8x128xf32>
    %129 = arith.addf %127, %128 : vector<8x128xf32>
    %130 = arith.negf %129 : vector<8x128xf32>
    %131 = math.exp %130 : vector<8x128xf32>
    %cst_34 = arith.constant 1.000000e+00 : f32
    %132 = vector.broadcast %cst_34 : f32 to vector<8x128xf32>
    %133 = arith.addf %132, %131 : vector<8x128xf32>
    %134 = arith.divf %132, %133 : vector<8x128xf32>
    %135 = vector.extract_strided_slice %116 {offsets = [0, 256], sizes = [8, 128], strides = [1, 1]} : vector<8x384xf32> to vector<8x128xf32>
    %136 = vector.extract_strided_slice %118 {offsets = [0, 256], sizes = [8, 128], strides = [1, 1]} : vector<8x384xf32> to vector<8x128xf32>
    %137 = vector.broadcast %9 : vector<1x128xf32> to vector<8x128xf32>
    %138 = arith.addf %136, %137 : vector<8x128xf32>
    %139 = arith.mulf %126, %138 : vector<8x128xf32>
    %140 = arith.addf %135, %139 : vector<8x128xf32>
    %141 = math.tanh %140 : vector<8x128xf32>
    %cst_35 = arith.constant 1.000000e+00 : f32
    %142 = vector.broadcast %cst_35 : f32 to vector<8x128xf32>
    %143 = arith.subf %142, %134 : vector<8x128xf32>
    %144 = arith.mulf %143, %141 : vector<8x128xf32>
    %145 = arith.mulf %134, %112 : vector<8x128xf32>
    %146 = arith.addf %144, %145 : vector<8x128xf32>
    %c4_i32 = arith.constant 4 : i32
    %c8_i32_36 = arith.constant 8 : i32
    %147 = arith.muli %c4_i32, %c8_i32_36 : i32
    %148 = tpu.assume_multiple %147, 8 : i32
    %149 = arith.index_cast %148 : i32 to index
    %c0_37 = arith.constant 0 : index
    %150 = vector.load %arg7[%149, %c0_37] : memref<64x384xf32, #tpu.memory_space<vmem>>, vector<8x384xf32>
    %151 = arith.truncf %146 : vector<8x128xf32> to vector<8x128xbf16>
    %cst_38 = arith.constant dense<0.000000e+00> : vector<8x384xf32>
    %152 = tpu.matmul %151, %8, %cst_38 {dimension_numbers = #tpu.dot_dimension_numbers<[1], [0], [0], [1], [0, 0, 1, 1], [], []>} : vector<8x128xbf16>, vector<128x384xbf16>, vector<8x384xf32> -> vector<8x384xf32>
    %153 = vector.extract_strided_slice %150 {offsets = [0, 0], sizes = [8, 128], strides = [1, 1]} : vector<8x384xf32> to vector<8x128xf32>
    %154 = vector.extract_strided_slice %152 {offsets = [0, 0], sizes = [8, 128], strides = [1, 1]} : vector<8x384xf32> to vector<8x128xf32>
    %155 = arith.addf %153, %154 : vector<8x128xf32>
    %156 = arith.negf %155 : vector<8x128xf32>
    %157 = math.exp %156 : vector<8x128xf32>
    %cst_39 = arith.constant 1.000000e+00 : f32
    %158 = vector.broadcast %cst_39 : f32 to vector<8x128xf32>
    %159 = arith.addf %158, %157 : vector<8x128xf32>
    %160 = arith.divf %158, %159 : vector<8x128xf32>
    %161 = vector.extract_strided_slice %150 {offsets = [0, 128], sizes = [8, 128], strides = [1, 1]} : vector<8x384xf32> to vector<8x128xf32>
    %162 = vector.extract_strided_slice %152 {offsets = [0, 128], sizes = [8, 128], strides = [1, 1]} : vector<8x384xf32> to vector<8x128xf32>
    %163 = arith.addf %161, %162 : vector<8x128xf32>
    %164 = arith.negf %163 : vector<8x128xf32>
    %165 = math.exp %164 : vector<8x128xf32>
    %cst_40 = arith.constant 1.000000e+00 : f32
    %166 = vector.broadcast %cst_40 : f32 to vector<8x128xf32>
    %167 = arith.addf %166, %165 : vector<8x128xf32>
    %168 = arith.divf %166, %167 : vector<8x128xf32>
    %169 = vector.extract_strided_slice %150 {offsets = [0, 256], sizes = [8, 128], strides = [1, 1]} : vector<8x384xf32> to vector<8x128xf32>
    %170 = vector.extract_strided_slice %152 {offsets = [0, 256], sizes = [8, 128], strides = [1, 1]} : vector<8x384xf32> to vector<8x128xf32>
    %171 = vector.broadcast %9 : vector<1x128xf32> to vector<8x128xf32>
    %172 = arith.addf %170, %171 : vector<8x128xf32>
    %173 = arith.mulf %160, %172 : vector<8x128xf32>
    %174 = arith.addf %169, %173 : vector<8x128xf32>
    %175 = math.tanh %174 : vector<8x128xf32>
    %cst_41 = arith.constant 1.000000e+00 : f32
    %176 = vector.broadcast %cst_41 : f32 to vector<8x128xf32>
    %177 = arith.subf %176, %168 : vector<8x128xf32>
    %178 = arith.mulf %177, %175 : vector<8x128xf32>
    %179 = arith.mulf %168, %146 : vector<8x128xf32>
    %180 = arith.addf %178, %179 : vector<8x128xf32>
    %c5_i32 = arith.constant 5 : i32
    %c8_i32_42 = arith.constant 8 : i32
    %181 = arith.muli %c5_i32, %c8_i32_42 : i32
    %182 = tpu.assume_multiple %181, 8 : i32
    %183 = arith.index_cast %182 : i32 to index
    %c0_43 = arith.constant 0 : index
    %184 = vector.load %arg7[%183, %c0_43] : memref<64x384xf32, #tpu.memory_space<vmem>>, vector<8x384xf32>
    %185 = arith.truncf %180 : vector<8x128xf32> to vector<8x128xbf16>
    %cst_44 = arith.constant dense<0.000000e+00> : vector<8x384xf32>
    %186 = tpu.matmul %185, %8, %cst_44 {dimension_numbers = #tpu.dot_dimension_numbers<[1], [0], [0], [1], [0, 0, 1, 1], [], []>} : vector<8x128xbf16>, vector<128x384xbf16>, vector<8x384xf32> -> vector<8x384xf32>
    %187 = vector.extract_strided_slice %184 {offsets = [0, 0], sizes = [8, 128], strides = [1, 1]} : vector<8x384xf32> to vector<8x128xf32>
    %188 = vector.extract_strided_slice %186 {offsets = [0, 0], sizes = [8, 128], strides = [1, 1]} : vector<8x384xf32> to vector<8x128xf32>
    %189 = arith.addf %187, %188 : vector<8x128xf32>
    %190 = arith.negf %189 : vector<8x128xf32>
    %191 = math.exp %190 : vector<8x128xf32>
    %cst_45 = arith.constant 1.000000e+00 : f32
    %192 = vector.broadcast %cst_45 : f32 to vector<8x128xf32>
    %193 = arith.addf %192, %191 : vector<8x128xf32>
    %194 = arith.divf %192, %193 : vector<8x128xf32>
    %195 = vector.extract_strided_slice %184 {offsets = [0, 128], sizes = [8, 128], strides = [1, 1]} : vector<8x384xf32> to vector<8x128xf32>
    %196 = vector.extract_strided_slice %186 {offsets = [0, 128], sizes = [8, 128], strides = [1, 1]} : vector<8x384xf32> to vector<8x128xf32>
    %197 = arith.addf %195, %196 : vector<8x128xf32>
    %198 = arith.negf %197 : vector<8x128xf32>
    %199 = math.exp %198 : vector<8x128xf32>
    %cst_46 = arith.constant 1.000000e+00 : f32
    %200 = vector.broadcast %cst_46 : f32 to vector<8x128xf32>
    %201 = arith.addf %200, %199 : vector<8x128xf32>
    %202 = arith.divf %200, %201 : vector<8x128xf32>
    %203 = vector.extract_strided_slice %184 {offsets = [0, 256], sizes = [8, 128], strides = [1, 1]} : vector<8x384xf32> to vector<8x128xf32>
    %204 = vector.extract_strided_slice %186 {offsets = [0, 256], sizes = [8, 128], strides = [1, 1]} : vector<8x384xf32> to vector<8x128xf32>
    %205 = vector.broadcast %9 : vector<1x128xf32> to vector<8x128xf32>
    %206 = arith.addf %204, %205 : vector<8x128xf32>
    %207 = arith.mulf %194, %206 : vector<8x128xf32>
    %208 = arith.addf %203, %207 : vector<8x128xf32>
    %209 = math.tanh %208 : vector<8x128xf32>
    %cst_47 = arith.constant 1.000000e+00 : f32
    %210 = vector.broadcast %cst_47 : f32 to vector<8x128xf32>
    %211 = arith.subf %210, %202 : vector<8x128xf32>
    %212 = arith.mulf %211, %209 : vector<8x128xf32>
    %213 = arith.mulf %202, %180 : vector<8x128xf32>
    %214 = arith.addf %212, %213 : vector<8x128xf32>
    %c6_i32 = arith.constant 6 : i32
    %c8_i32_48 = arith.constant 8 : i32
    %215 = arith.muli %c6_i32, %c8_i32_48 : i32
    %216 = tpu.assume_multiple %215, 8 : i32
    %217 = arith.index_cast %216 : i32 to index
    %c0_49 = arith.constant 0 : index
    %218 = vector.load %arg7[%217, %c0_49] : memref<64x384xf32, #tpu.memory_space<vmem>>, vector<8x384xf32>
    %219 = arith.truncf %214 : vector<8x128xf32> to vector<8x128xbf16>
    %cst_50 = arith.constant dense<0.000000e+00> : vector<8x384xf32>
    %220 = tpu.matmul %219, %8, %cst_50 {dimension_numbers = #tpu.dot_dimension_numbers<[1], [0], [0], [1], [0, 0, 1, 1], [], []>} : vector<8x128xbf16>, vector<128x384xbf16>, vector<8x384xf32> -> vector<8x384xf32>
    %221 = vector.extract_strided_slice %218 {offsets = [0, 0], sizes = [8, 128], strides = [1, 1]} : vector<8x384xf32> to vector<8x128xf32>
    %222 = vector.extract_strided_slice %220 {offsets = [0, 0], sizes = [8, 128], strides = [1, 1]} : vector<8x384xf32> to vector<8x128xf32>
    %223 = arith.addf %221, %222 : vector<8x128xf32>
    %224 = arith.negf %223 : vector<8x128xf32>
    %225 = math.exp %224 : vector<8x128xf32>
    %cst_51 = arith.constant 1.000000e+00 : f32
    %226 = vector.broadcast %cst_51 : f32 to vector<8x128xf32>
    %227 = arith.addf %226, %225 : vector<8x128xf32>
    %228 = arith.divf %226, %227 : vector<8x128xf32>
    %229 = vector.extract_strided_slice %218 {offsets = [0, 128], sizes = [8, 128], strides = [1, 1]} : vector<8x384xf32> to vector<8x128xf32>
    %230 = vector.extract_strided_slice %220 {offsets = [0, 128], sizes = [8, 128], strides = [1, 1]} : vector<8x384xf32> to vector<8x128xf32>
    %231 = arith.addf %229, %230 : vector<8x128xf32>
    %232 = arith.negf %231 : vector<8x128xf32>
    %233 = math.exp %232 : vector<8x128xf32>
    %cst_52 = arith.constant 1.000000e+00 : f32
    %234 = vector.broadcast %cst_52 : f32 to vector<8x128xf32>
    %235 = arith.addf %234, %233 : vector<8x128xf32>
    %236 = arith.divf %234, %235 : vector<8x128xf32>
    %237 = vector.extract_strided_slice %218 {offsets = [0, 256], sizes = [8, 128], strides = [1, 1]} : vector<8x384xf32> to vector<8x128xf32>
    %238 = vector.extract_strided_slice %220 {offsets = [0, 256], sizes = [8, 128], strides = [1, 1]} : vector<8x384xf32> to vector<8x128xf32>
    %239 = vector.broadcast %9 : vector<1x128xf32> to vector<8x128xf32>
    %240 = arith.addf %238, %239 : vector<8x128xf32>
    %241 = arith.mulf %228, %240 : vector<8x128xf32>
    %242 = arith.addf %237, %241 : vector<8x128xf32>
    %243 = math.tanh %242 : vector<8x128xf32>
    %cst_53 = arith.constant 1.000000e+00 : f32
    %244 = vector.broadcast %cst_53 : f32 to vector<8x128xf32>
    %245 = arith.subf %244, %236 : vector<8x128xf32>
    %246 = arith.mulf %245, %243 : vector<8x128xf32>
    %247 = arith.mulf %236, %214 : vector<8x128xf32>
    %248 = arith.addf %246, %247 : vector<8x128xf32>
    %c7_i32 = arith.constant 7 : i32
    %c8_i32_54 = arith.constant 8 : i32
    %249 = arith.muli %c7_i32, %c8_i32_54 : i32
    %250 = tpu.assume_multiple %249, 8 : i32
    %251 = arith.index_cast %250 : i32 to index
    %c0_55 = arith.constant 0 : index
    %252 = vector.load %arg7[%251, %c0_55] : memref<64x384xf32, #tpu.memory_space<vmem>>, vector<8x384xf32>
    %253 = arith.truncf %248 : vector<8x128xf32> to vector<8x128xbf16>
    %cst_56 = arith.constant dense<0.000000e+00> : vector<8x384xf32>
    %254 = tpu.matmul %253, %8, %cst_56 {dimension_numbers = #tpu.dot_dimension_numbers<[1], [0], [0], [1], [0, 0, 1, 1], [], []>} : vector<8x128xbf16>, vector<128x384xbf16>, vector<8x384xf32> -> vector<8x384xf32>
    %255 = vector.extract_strided_slice %252 {offsets = [0, 0], sizes = [8, 128], strides = [1, 1]} : vector<8x384xf32> to vector<8x128xf32>
    %256 = vector.extract_strided_slice %254 {offsets = [0, 0], sizes = [8, 128], strides = [1, 1]} : vector<8x384xf32> to vector<8x128xf32>
    %257 = arith.addf %255, %256 : vector<8x128xf32>
    %258 = arith.negf %257 : vector<8x128xf32>
    %259 = math.exp %258 : vector<8x128xf32>
    %cst_57 = arith.constant 1.000000e+00 : f32
    %260 = vector.broadcast %cst_57 : f32 to vector<8x128xf32>
    %261 = arith.addf %260, %259 : vector<8x128xf32>
    %262 = arith.divf %260, %261 : vector<8x128xf32>
    %263 = vector.extract_strided_slice %252 {offsets = [0, 128], sizes = [8, 128], strides = [1, 1]} : vector<8x384xf32> to vector<8x128xf32>
    %264 = vector.extract_strided_slice %254 {offsets = [0, 128], sizes = [8, 128], strides = [1, 1]} : vector<8x384xf32> to vector<8x128xf32>
    %265 = arith.addf %263, %264 : vector<8x128xf32>
    %266 = arith.negf %265 : vector<8x128xf32>
    %267 = math.exp %266 : vector<8x128xf32>
    %cst_58 = arith.constant 1.000000e+00 : f32
    %268 = vector.broadcast %cst_58 : f32 to vector<8x128xf32>
    %269 = arith.addf %268, %267 : vector<8x128xf32>
    %270 = arith.divf %268, %269 : vector<8x128xf32>
    %271 = vector.extract_strided_slice %252 {offsets = [0, 256], sizes = [8, 128], strides = [1, 1]} : vector<8x384xf32> to vector<8x128xf32>
    %272 = vector.extract_strided_slice %254 {offsets = [0, 256], sizes = [8, 128], strides = [1, 1]} : vector<8x384xf32> to vector<8x128xf32>
    %273 = vector.broadcast %9 : vector<1x128xf32> to vector<8x128xf32>
    %274 = arith.addf %272, %273 : vector<8x128xf32>
    %275 = arith.mulf %262, %274 : vector<8x128xf32>
    %276 = arith.addf %271, %275 : vector<8x128xf32>
    %277 = math.tanh %276 : vector<8x128xf32>
    %cst_59 = arith.constant 1.000000e+00 : f32
    %278 = vector.broadcast %cst_59 : f32 to vector<8x128xf32>
    %279 = arith.subf %278, %270 : vector<8x128xf32>
    %280 = arith.mulf %279, %277 : vector<8x128xf32>
    %281 = arith.mulf %270, %248 : vector<8x128xf32>
    %282 = arith.addf %280, %281 : vector<8x128xf32>
    %c8_i32_60 = arith.constant 8 : i32
    %c0_61 = arith.constant 0 : index
    %c0_62 = arith.constant 0 : index
    %283 = vector.load %arg6[%c0_61, %c0_62] : memref<8x128xf32, #tpu.memory_space<vmem>>, vector<8x128xf32>
    tpu.vector_store %arg6[%c0_61, %c0_62], %282 {strides = array<i32>} : memref<8x128xf32, #tpu.memory_space<vmem>>, vector<8x128xf32>,
    return
  }
  func.func @transform_0(%arg0: i32) -> (i32, i32, i32) {
    %c0_i32 = arith.constant 0 : i32
    %c0_i32_0 = arith.constant 0 : i32
    %c0_i32_1 = arith.constant 0 : i32
    return %c0_i32, %arg0, %c0_i32_0 : i32, i32, i32
  }
  func.func @transform_1(%arg0: i32) -> (i32, i32) {
    %c0_i32 = arith.constant 0 : i32
    %c0_i32_0 = arith.constant 0 : i32
    %c0_i32_1 = arith.constant 0 : i32
    return %c0_i32, %c0_i32_0 : i32, i32
  }
  func.func @transform_2(%arg0: i32) -> (i32, i32) {
    %c0_i32 = arith.constant 0 : i32
    %c0_i32_0 = arith.constant 0 : i32
    %c0_i32_1 = arith.constant 0 : i32
    return %c0_i32, %c0_i32_0 : i32, i32
  }
  func.func @transform_3(%arg0: i32) -> (i32, i32) {
    %c0_i32 = arith.constant 0 : i32
    %c0_i32_0 = arith.constant 0 : i32
    %c0_i32_1 = arith.constant 0 : i32
    return %c0_i32, %c0_i32_0 : i32, i32
  }
  func.func @transform_4(%arg0: i32) -> (i32, i32) {
    %c0_i32 = arith.constant 0 : i32
    %c0_i32_0 = arith.constant 0 : i32
    %c0_i32_1 = arith.constant 0 : i32
    return %c0_i32, %c0_i32_0 : i32, i32
  }
  func.func @transform_5(%arg0: i32) -> (i32, i32) {
    %c0_i32 = arith.constant 0 : i32
    %c0_i32_0 = arith.constant 0 : i32
    return %arg0, %c0_i32 : i32, i32
  }
}

</mosaic_0001>

<bundles_post_ra>
// kernel: tpu_custom_call.1
= control target key start
LH: loop header
LB: loop body
LE: loop exit
PB: predicated region body
PF: predicated region fallthrough
CT: control target
= control target key end

     0   :  { %10 = vsyncpa [#allocation4], 0  ;;  %s3048_s0 = inlined_call_operand.hbm [shape: bf16[8,8,300], index: 0, kind: input, shape index: {}]   ;;  %s3049_s1 = inlined_call_operand.hbm [shape: bf16[300,384], index: 1, kind: input, shape index: {}]   ;;  %s3050_s2 = inlined_call_operand.hbm [shape: bf16[128,384], index: 2, kind: input, shape index: {}]   ;;  %s3051_s3 = inlined_call_operand.hbm [shape: f32[1,384], index: 3, kind: input, shape index: {}]   ;;  %s3052_s4 = inlined_call_operand.vmem [shape: f32[1,128], index: 4, kind: input, shape index: {}]   ;;  %s3053_s5 = inlined_call_operand.hbm [shape: f32[8,128], index: 5, kind: output, shape index: {}]  }
   0x1   :  { %11 = vsyncpa [#allocation7], 0 }
   0x2   :  { %12 = vsyncpa [#allocation10], 0 }
   0x3   :  { %13 = vsyncpa [#allocation5], 0  ;;  %s31_s20 = sshll.u32 %s3049_s1, 4  ;;  %s2505_s21 = smov [#allocation6]   ;;  %s32_s20 = int_to_ptr.hbm [resolvable:$true] %s31_s20 }
   0x4   :  { %s33_s22 = sshll.u32 %s2505_s21, 4  ;;  %s18_s25 = sshll.u32 %s3048_s0, 4  ;;  %s34_s22 = int_to_ptr.vmem [resolvable:$true] %s33_s22  ;;  %s19_s25 = int_to_ptr.hbm [resolvable:$true] %s18_s25 }
   0x5   :  { %s2506_s26 = smov 192   ;;  %s2507_s27 = smov 12  }
   0x6   :  { %39 = dma.hbm_to_vmem [thread:$0]  %s32_s20, 7296, %s34_s22, [#allocation7], %s2506_s26, %s2506_s26, %s2507_s27  }
   0x7   :  { %s2508_s28 = smov [#allocation3]   ;;  %s44_s7 = sshll.u32 %s3050_s2, 4  ;;  %s45_s7 = int_to_ptr.hbm [resolvable:$true] %s44_s7 }
   0x8   :  { %s20_s29 = sshll.u32 %s2508_s28, 4  ;;  %s58_s9 = sshll.u32 %s3051_s3, 4  ;;  %s21_s29 = int_to_ptr.vmem [resolvable:$true] %s20_s29  ;;  %s59_s9 = int_to_ptr.hbm [resolvable:$true] %s58_s9 }
   0x9   :  { %26 = dma.hbm_to_vmem [thread:$0]  %s19_s25, 1536, %s21_s29, [#allocation4], %s2506_s26, %s2506_s26, %s2507_s27  }
   0xa   :  { %s2509_s10 = smov [#allocation8]   ;;  %s2510_s0 = smov [#allocation9]  }
   0xb   :  { %s46_s11 = sshll.u32 %s2509_s10, 4  ;;  %s60_s12 = sshll.u32 %s2510_s0, 4  ;;  %s47_s11 = int_to_ptr.vmem [resolvable:$true] %s46_s11  ;;  %s61_s12 = int_to_ptr.vmem [resolvable:$true] %s60_s12 }
   0xc   :  { %52 = dma.hbm_to_vmem [thread:$0]  %s45_s7, 3072, %s47_s11, [#allocation7], %s2506_s26, %s2506_s26, %s2507_s27  }
   0xd   :  { %63 = dma.hbm_to_vmem [thread:$0]  %s59_s9, 48, %s61_s12, [#allocation10]  }
   0xe   :  { %2497 = dma.done.wait [#allocation4], 1536  }
   0xf   :  { %2498 = vsyncadd [#allocation4], 4294965760 }
  0x10   :  { %2499 = dma.done.wait [#allocation7], 10368  }
  0x11   :  { %2500 = vsyncadd [#allocation7], 4294956928 }
  0x12   :  { %2501 = dma.done.wait [#allocation10], 48  }
  0x13   :  { %2502 = vsyncadd [#allocation10], 4294967248  ;;  %vm557_vm0 = vcmask 1045504   ;;  %v1928_v0 = vld [vmem:[#allocation6 + $0xa8] sm:$0xf]  ;;  %vm544_vm1 = vcmask 359424  }
  0x14   :  { %v2228_v1 = vld [vmem:[#allocation6 + $0xb0] sm:$0xf0]  ;;  %v2024_v2 = vld [vmem:[#allocation6 + $0x168] sm:$0xf]  ;;  %v2227_v5 = vld [vmem:[#allocation6 + $0xac] sm:$0xf] }
  0x15   :  { %v1929_v3 = vor.u32 %v2228_v1, %v1928_v0  ;;  %v2252_v4 = vld [vmem:[#allocation6 + $0x170] sm:$0xf0]  ;;  %v1930_v6 = vld [vmem:[#allocation6 + $0xb4] sm:$0xf0]  ;;  %v2060_v9 = vld [vmem:[#allocation6 + $0x1b0] sm:$0xf] }
  0x16   :  { %v2025_v7 = vor.u32 %v2252_v4, %v2024_v2  ;;  %v1933_v8 = vor.u32 %v2227_v5, %v1930_v6  ;;  %v2261_v10 = vld [vmem:[#allocation6 + $0x1b8] sm:$0x30]  ;;  %v1916_v11 = vld [vmem:[#allocation6 + $0x90] sm:$0xf]  ;;  %v2224_v18 = vld [vmem:[#allocation6 + $0x94] sm:$0xf] }
  0x17   :  { %567 = vmatpush.bf16.msra.mxu0 %v1929_v3  ;;  %v2061_v12 = vor.u32 %v2261_v10, %v2060_v9  ;;  %v2225_v13 = vld [vmem:[#allocation6 + $0x98] sm:$0xf0]  ;;  %v2012_v14 = vld [vmem:[#allocation6 + $0x150] sm:$0xf]  ;;  %v1918_v19 = vld [vmem:[#allocation6 + $0x9c] sm:$0xf0] }
  0x18   :  { %v2249_v15 = vld [vmem:[#allocation6 + $0x158] sm:$0xf0]  ;;  %596 = vmatpush.bf16.msra.mxu1 %v2025_v7  ;;  %654 = vmatpush.bf16.msra.mxu3 %v1933_v8  ;;  %v1917_v16 = vor.u32 %v2225_v13, %v1916_v11  ;;  %v2048_v20 = vld [vmem:[#allocation6 + $0x198] sm:$0xf]  ;;  %v1921_v22 = vor.u32 %v2224_v18, %v1918_v19  ;;  %v2258_v23 = vld [vmem:[#allocation6 + $0x1a0] sm:$0xf0] }
  0x19   :  { %v2013_v17 = vor.u32 %v2249_v15, %v2012_v14  ;;  %v559_v21 = vsel %vm557_vm0, %v2061_v12, 0  ;;  %v1904_v24 = vld [vmem:[#allocation6 + $0x78] sm:$0xf]  ;;  %v2049_v25 = vor.u32 %v2258_v23, %v2048_v20  ;;  %v2222_v26 = vld [vmem:[#allocation6 + $0x80] sm:$0xf0]  ;;  %s1775_s18 = sshll.u32 %s3053_s5, 4  ;;  %s1776_s18 = int_to_ptr.hbm [resolvable:$true] %s1775_s18 }
  0x1a   :  { %630 = vmatpush.bf16.msra.mxu2 %v559_v21  ;;  %v2000_v27 = vld [vmem:[#allocation6 + $0x138] sm:$0xf]  ;;  %v2246_v28 = vld [vmem:[#allocation6 + $0x140] sm:$0xf0]  ;;  %v1905_v29 = vor.u32 %v2222_v26, %v1904_v24  ;;  %v2221_v30 = vld [vmem:[#allocation6 + $0x7c] sm:$0xf] }
  0x1b   :  { %568 = vmatpush.bf16.msra.mxu0 %v1917_v16  ;;  %v1906_v31 = vld [vmem:[#allocation6 + $0x84] sm:$0xf0]  ;;  %v2036_v32 = vld [vmem:[#allocation6 + $0x180] sm:$0xf]  ;;  %v2001_v33 = vor.u32 %v2246_v28, %v2000_v27  ;;  %v2255_v35 = vld [vmem:[#allocation6 + $0x188] sm:$0xf0] }
  0x1c   :  { %597 = vmatpush.bf16.msra.mxu1 %v2013_v17  ;;  %655 = vmatpush.bf16.msra.mxu3 %v1921_v22  ;;  %v1909_v34 = vor.u32 %v2221_v30, %v1906_v31  ;;  %v1892_v36 = vld [vmem:[#allocation6 + $0x60] sm:$0xf]  ;;  %v2219_v37 = vld [vmem:[#allocation6 + $0x68] sm:$0xf0]  ;;  %v1804_v40 = vld [vmem:[#allocation3 + $0x8] sm:$0xf]  ;;  %v2037_v41 = vor.u32 %v2255_v35, %v2036_v32 }
  0x1d   :  { %v1988_v38 = vld [vmem:[#allocation6 + $0x120] sm:$0xf]  ;;  %v2243_v39 = vld [vmem:[#allocation6 + $0x128] sm:$0xf0]  ;;  %v2196_v42 = vld [vmem:[#allocation3 + $0x10] sm:$0xf0]  ;;  %v1893_v45 = vor.u32 %v2219_v37, %v1892_v36 }
  0x1e   :  { %631 = vmatpush.bf16.msra.mxu2 %v2049_v25  ;;  %v2218_v43 = vld [vmem:[#allocation6 + $0x64] sm:$0xf]  ;;  %v1894_v44 = vld [vmem:[#allocation6 + $0x6c] sm:$0xf0]  ;;  %v1989_v46 = vor.u32 %v2243_v39, %v1988_v38  ;;  %v1880_v48 = vld [vmem:[#allocation6 + $0x48] sm:$0xf]  ;;  %v2556_v51 = vor.u32 %v2196_v42, %v1804_v40 }
  0x1f   :  { %569 = vmatpush.bf16.msra.mxu0 %v1905_v29  ;;  %v1897_v47 = vor.u32 %v2218_v43, %v1894_v44  ;;  %v2216_v49 = vld [vmem:[#allocation6 + $0x50] sm:$0xf0]  ;;  %v1976_v50 = vld [vmem:[#allocation6 + $0x108] sm:$0xf]  ;;  %v2215_v53 = vld [vmem:[#allocation6 + $0x4c] sm:$0xf] }
  0x20   :  { %598 = vmatpush.bf16.msra.mxu1 %v2001_v33  ;;  %656 = vmatpush.bf16.msra.mxu3 %v1909_v34  ;;  %v2240_v52 = vld [vmem:[#allocation6 + $0x110] sm:$0xf0]  ;;  %v1882_v54 = vld [vmem:[#allocation6 + $0x54] sm:$0xf0]  ;;  %v1881_v55 = vor.u32 %v2216_v49, %v1880_v48  ;;  %v1868_v58 = vld [vmem:[#allocation6 + $0x30] sm:$0xf] }
  0x21   :  { %v1977_v56 = vor.u32 %v2240_v52, %v1976_v50  ;;  %v1885_v57 = vor.u32 %v2215_v53, %v1882_v54  ;;  %v2213_v59 = vld [vmem:[#allocation6 + $0x38] sm:$0xf0]  ;;  %v1964_v60 = vld [vmem:[#allocation6 + $0xf0] sm:$0xf]  ;;  %v2212_v62 = vld [vmem:[#allocation6 + $0x34] sm:$0xf] }
  0x22   :  { %632 = vmatpush.bf16.msra.mxu2 %v2037_v41  ;;  %v2237_v61 = vld [vmem:[#allocation6 + $0xf8] sm:$0xf0]  ;;  %v1870_v63 = vld [vmem:[#allocation6 + $0x3c] sm:$0xf0]  ;;  %v1869_v0 = vor.u32 %v2213_v59, %v1868_v58  ;;  %v1856_v1 = vld [vmem:[#allocation6 + $0x18] sm:$0xf] }
  0x23   :  { %570 = vmatpush.bf16.msra.mxu0 %v1893_v45  ;;  %v2210_v2 = vld [vmem:[#allocation6 + $0x20] sm:$0xf0]  ;;  %v1965_v3 = vor.u32 %v2237_v61, %v1964_v60  ;;  %v1873_v4 = vor.u32 %v2212_v62, %v1870_v63  ;;  %v1952_v5 = vld [vmem:[#allocation6 + $0xd8] sm:$0xf]  ;;  %v2209_v7 = vld [vmem:[#allocation6 + $0x1c] sm:$0xf] }
  0x24   :  { %599 = vmatpush.bf16.msra.mxu1 %v1989_v46  ;;  %657 = vmatpush.bf16.msra.mxu3 %v1897_v47  ;;  %v2234_v6 = vld [vmem:[#allocation6 + $0xe0] sm:$0xf0]  ;;  %v1858_v8 = vld [vmem:[#allocation6 + $0x24] sm:$0xf0]  ;;  %v2260_v9 = vld [vmem:[#allocation6 + $0x1b4] sm:$0xf]  ;;  %v1857_v13 = vor.u32 %v2210_v2, %v1856_v1 }
  0x25   :  { %2070 = vmatmul.msk.bf16.vlgmr.msra.gmra.mxu2 %vm544_vm1, %v2556_v51  ;;  %v2062_v10 = vld [vmem:[#allocation6 + $0x1bc] sm:$0x30]  ;;  %v2207_v12 = vld [vmem:[#allocation6 + $0x8] sm:$0xf0]  ;;  %v1953_v14 = vor.u32 %v2234_v6, %v1952_v5  ;;  %v2026_v17 = vld [vmem:[#allocation6 + $0x174] sm:$0xf0]  ;;  %v1861_v18 = vor.u32 %v2209_v7, %v1858_v8 }
  0x26   :  { %v1844_v11 = vld [vmem:[#allocation6] sm:$0xf]  ;;  %v2251_v16 = vld [vmem:[#allocation6 + $0x16c] sm:$0xf]  ;;  %v2065_v22 = vor.u32 %v2260_v9, %v2062_v10  ;;  %v2206_v24 = vld [vmem:[#allocation6 + $0x4] sm:$0xf] }
  0x27   :  { %571 = vmatpush.bf16.msra.mxu0 %v1881_v55  ;;  %v1940_v15 = vld [vmem:[#allocation6 + $0xc0] sm:$0xf]  ;;  %v2231_v19 = vld [vmem:[#allocation6 + $0xc8] sm:$0xf0]  ;;  %v2029_v23 = vor.u32 %v2251_v16, %v2026_v17  ;;  %v1846_v25 = vld [vmem:[#allocation6 + $0xc] sm:$0xf0]  ;;  %v1845_v30 = vor.u32 %v2207_v12, %v1844_v11 }
  0x28   :  { %600 = vmatpush.bf16.msra.mxu1 %v1977_v56  ;;  %658 = vmatpush.bf16.msra.mxu3 %v1885_v57  ;;  %v1816_v20 = vld [vmem:[#allocation3 + $0x20] sm:$0xf]  ;;  %v2199_v21 = vld [vmem:[#allocation3 + $0x28] sm:$0xf0]  ;;  %v2248_v28 = vld [vmem:[#allocation6 + $0x154] sm:$0xf]  ;;  %v1941_v35 = vor.u32 %v2231_v19, %v1940_v15  ;;  %v1849_v36 = vor.u32 %v2206_v24, %v1846_v25 }
  0x29   :  { %v1796_v26 = vld [vmem:[#allocation3] sm:$0xf]  ;;  %v2195_v27 = vld [vmem:[#allocation3 + $0x8] sm:$0xf0]  ;;  %683 = vmatpush.bf16.msrb.mxu2 %v2029_v23  ;;  %v2194_v31 = vld [vmem:[#allocation3 + $0x4] sm:$0xf]  ;;  %v2561_v40 = vor.u32 %v2199_v21, %v1816_v20 }
  0x2a   :  { %v2014_v29 = vld [vmem:[#allocation6 + $0x15c] sm:$0xf0]  ;;  %v1936_v32 = vld [vmem:[#allocation6 + $0xb0] sm:$0xf]  ;;  %v2229_v33 = vld [vmem:[#allocation6 + $0xb8] sm:$0xf0]  ;;  %v2563_v44 = vor.u32 %v2195_v27, %v1796_v26 }
  0x2b   :  { %572 = vmatpush.bf16.msra.mxu0 %v1869_v0  ;;  %v2017_v34 = vor.u32 %v2248_v28, %v2014_v29  ;;  %v1798_v37 = vld [vmem:[#allocation3 + $0xc] sm:$0xf0]  ;;  %v562_v38 = vsel %vm557_vm0, %v2065_v22, 0  ;;  %v2245_v39 = vld [vmem:[#allocation6 + $0x13c] sm:$0xf]  ;;  %v1937_v45 = vor.u32 %v2229_v33, %v1936_v32 }
  0x2c   :  { %601 = vmatpush.bf16.msra.mxu1 %v1965_v3  ;;  %659 = vmatpush.bf16.msra.mxu3 %v1873_v4  ;;  %v2002_v41 = vld [vmem:[#allocation6 + $0x144] sm:$0xf0]  ;;  %v2032_v42 = vld [vmem:[#allocation6 + $0x170] sm:$0xf]  ;;  %v2253_v43 = vld [vmem:[#allocation6 + $0x178] sm:$0xf0]  ;;  %v2565_v48 = vor.u32 %v2194_v31, %v1798_v37 }
  0x2d   :  { %684 = vmatpush.bf16.msrb.mxu2 %v2017_v34  ;;  %v2257_v46 = vld [vmem:[#allocation6 + $0x19c] sm:$0xf]  ;;  %v2050_v47 = vld [vmem:[#allocation6 + $0x1a4] sm:$0xf0]  ;;  %v1924_v49 = vld [vmem:[#allocation6 + $0x98] sm:$0xf]  ;;  %v2005_v52 = vor.u32 %v2245_v39, %v2002_v41  ;;  %v2033_v53 = vor.u32 %v2253_v43, %v2032_v42 }
  0x2e   :  { %v2226_v50 = vld [vmem:[#allocation6 + $0xa0] sm:$0xf0]  ;;  %v2053_v55 = vor.u32 %v2257_v46, %v2050_v47  ;;  %v1990_v56 = vld [vmem:[#allocation6 + $0x12c] sm:$0xf0]  ;;  %v2020_v57 = vld [vmem:[#allocation6 + $0x158] sm:$0xf] }
  0x2f   :  { %573 = vmatpush.bf16.msra.mxu0 %v1857_v13  ;;  %v2242_v54 = vld [vmem:[#allocation6 + $0x124] sm:$0xf]  ;;  %v1925_v59 = vor.u32 %v2226_v50, %v1924_v49  ;;  %v1912_v60 = vld [vmem:[#allocation6 + $0x80] sm:$0xf]  ;;  %v2223_v61 = vld [vmem:[#allocation6 + $0x88] sm:$0xf0] }
  0x30   :  { %602 = vmatpush.bf16.msra.mxu1 %v1953_v14  ;;  %660 = vmatpush.bf16.msra.mxu3 %v1861_v18  ;;  %v2250_v58 = vld [vmem:[#allocation6 + $0x160] sm:$0xf0]  ;;  %v1993_v62 = vor.u32 %v2242_v54, %v1990_v56  ;;  %v2239_v63 = vld [vmem:[#allocation6 + $0x10c] sm:$0xf]  ;;  %v1978_v1 = vld [vmem:[#allocation6 + $0x114] sm:$0xf0]  ;;  %v1913_v4 = vor.u32 %v2223_v61, %v1912_v60 }
  0x31   :  { %685 = vmatpush.bf16.msrb.mxu2 %v2005_v52  ;;  %v2021_v0 = vor.u32 %v2250_v58, %v2020_v57  ;;  %v2008_v2 = vld [vmem:[#allocation6 + $0x140] sm:$0xf]  ;;  %v2247_v3 = vld [vmem:[#allocation6 + $0x148] sm:$0xf0]  ;;  %v1900_v5 = vld [vmem:[#allocation6 + $0x68] sm:$0xf]  ;;  %v1981_v9 = vor.u32 %v2239_v63, %v1978_v1 }
  0x32   :  { %v2220_v6 = vld [vmem:[#allocation6 + $0x70] sm:$0xf0]  ;;  %v2254_v7 = vld [vmem:[#allocation6 + $0x184] sm:$0xf]  ;;  %v2038_v8 = vld [vmem:[#allocation6 + $0x18c] sm:$0xf0]  ;;  %v2009_v10 = vor.u32 %v2247_v3, %v2008_v2 }
  0x33   :  { %574 = vmatpush.bf16.msra.mxu0 %v1845_v30  ;;  %v2041_v11 = vor.u32 %v2254_v7, %v2038_v8  ;;  %v2236_v12 = vld [vmem:[#allocation6 + $0xf4] sm:$0xf]  ;;  %v1966_v13 = vld [vmem:[#allocation6 + $0xfc] sm:$0xf0]  ;;  %v1828_v14 = vld [vmem:[#allocation3 + $0x38] sm:$0xf]  ;;  %v1901_v17 = vor.u32 %v2220_v6, %v1900_v5 }
  0x34   :  { %603 = vmatpush.bf16.msra.mxu1 %v1941_v35  ;;  %661 = vmatpush.bf16.msra.mxu3 %v1849_v36  ;;  %v2202_v15 = vld [vmem:[#allocation3 + $0x40] sm:$0xf0]  ;;  %v1808_v16 = vld [vmem:[#allocation3 + $0x18] sm:$0xf]  ;;  %v1888_v19 = vld [vmem:[#allocation6 + $0x50] sm:$0xf]  ;;  %v1969_v23 = vor.u32 %v2236_v12, %v1966_v13 }
  0x35   :  { %2071 = vmatmul.msk.bf16.gmra.mxu2 %vm544_vm1, %v2561_v40  ;;  %v2198_v18 = vld [vmem:[#allocation3 + $0x20] sm:$0xf0]  ;;  %v2217_v20 = vld [vmem:[#allocation6 + $0x58] sm:$0xf0]  ;;  %v1810_v22 = vld [vmem:[#allocation3 + $0x24] sm:$0xf0]  ;;  %v2572_v24 = vor.u32 %v2202_v15, %v1828_v14 }
  0x36   :  { %575 = vmatmul.bf16.vlgmr.msra.gmra.mxu0 %v2563_v44  ;;  %686 = vmatpush.bf16.msrb.mxu2 %v1993_v62  ;;  %v2197_v21 = vld [vmem:[#allocation3 + $0x1c] sm:$0xf]  ;;  %v1954_v26 = vld [vmem:[#allocation6 + $0xe4] sm:$0xf0]  ;;  %v2574_v27 = vor.u32 %v2198_v18, %v1808_v16  ;;  %v1889_v28 = vor.u32 %v2217_v20, %v1888_v19  ;;  %v2244_v30 = vld [vmem:[#allocation6 + $0x130] sm:$0xf0] }
  0x37   :  { %717 = vmatpush.bf16.msrb.mxu0 %v562_v38  ;;  %604 = vmatmul.bf16.vlgmr.msra.gmra.mxu1 %v2565_v48  ;;  %v2233_v25 = vld [vmem:[#allocation6 + $0xdc] sm:$0xf]  ;;  %v1996_v29 = vld [vmem:[#allocation6 + $0x128] sm:$0xf]  ;;  %v2576_v31 = vor.u32 %v2197_v21, %v1810_v22  ;;  %v2230_v34 = vld [vmem:[#allocation6 + $0xc4] sm:$0xf] }
  0x38   :  { %741 = vmatpush.bf16.msrb.mxu1 %v1937_v45  ;;  %662 = vmatmul.bf16.vlgmr.msra.gmra.mxu3 %v2563_v44  ;;  %v1997_v32 = vor.u32 %v2244_v30, %v1996_v29  ;;  %v1957_v33 = vor.u32 %v2233_v25, %v1954_v26  ;;  %v1942_v35 = vld [vmem:[#allocation6 + $0xcc] sm:$0xf0]  ;;  %v2241_v37 = vld [vmem:[#allocation6 + $0x118] sm:$0xf0]  ;;  %v1876_v38 = vld [vmem:[#allocation6 + $0x38] sm:$0xf] }
  0x39   :  { %770 = vmatpush.bf16.msrb.mxu3 %v2033_v53  ;;  %v1984_v36 = vld [vmem:[#allocation6 + $0x110] sm:$0xf]  ;;  %v2214_v39 = vld [vmem:[#allocation6 + $0x40] sm:$0xf0]  ;;  %v1972_v42 = vld [vmem:[#allocation6 + $0xf8] sm:$0xf]  ;;  %v1945_v43 = vor.u32 %v2230_v34, %v1942_v35 }
  0x3a   :  { %687 = vmatpush.bf16.msrb.mxu2 %v1981_v9  ;;  %v1985_v41 = vor.u32 %v2241_v37, %v1984_v36  ;;  %v1877_v45 = vor.u32 %v2214_v39, %v1876_v38  ;;  %v2238_v46 = vld [vmem:[#allocation6 + $0x100] sm:$0xf0]  ;;  %v1864_v47 = vld [vmem:[#allocation6 + $0x20] sm:$0xf]  ;;  %v2211_v49 = vld [vmem:[#allocation6 + $0x28] sm:$0xf0] }
  0x3b   :  { %718 = vmatpush.bf16.msrb.mxu0 %v2053_v55  ;;  %v1973_v50 = vor.u32 %v2238_v46, %v1972_v42  ;;  %v1865_v52 = vor.u32 %v2211_v49, %v1864_v47  ;;  %v1960_v53 = vld [vmem:[#allocation6 + $0xe0] sm:$0xf]  ;;  %v2235_v54 = vld [vmem:[#allocation6 + $0xe8] sm:$0xf0]  ;;  %v1840_v56 = vld [vmem:[#allocation3 + $0x50] sm:$0xf] }
  0x3c   :  { %742 = vmatpush.bf16.msrb.mxu1 %v1925_v59  ;;  %v1961_v55 = vor.u32 %v2235_v54, %v1960_v53  ;;  %v2205_v57 = vld [vmem:[#allocation3 + $0x58] sm:$0xf0]  ;;  %v1820_v58 = vld [vmem:[#allocation3 + $0x30] sm:$0xf]  ;;  %v2200_v60 = vld [vmem:[#allocation3 + $0x34] sm:$0xf] }
  0x3d   :  { %771 = vmatpush.bf16.msrb.mxu3 %v2021_v0  ;;  %v2201_v59 = vld [vmem:[#allocation3 + $0x38] sm:$0xf0]  ;;  %v1822_v61 = vld [vmem:[#allocation3 + $0x3c] sm:$0xf0]  ;;  %v2583_v62 = vor.u32 %v2205_v57, %v1840_v56  ;;  %v1852_v0 = vld [vmem:[#allocation6 + $0x8] sm:$0xf] }
  0x3e   :  { %688 = vmatpush.bf16.msrb.mxu2 %v1969_v23  ;;  %v2585_v63 = vor.u32 %v2201_v59, %v1820_v58  ;;  %v2208_v1 = vld [vmem:[#allocation6 + $0x10] sm:$0xf0]  ;;  %v1948_v2 = vld [vmem:[#allocation6 + $0xc8] sm:$0xf]  ;;  %v2587_v3 = vor.u32 %v2200_v60, %v1822_v61  ;;  %v2168_v7 = vld [vmem:[#allocation8 + $0xa8] sm:$0xf] }
  0x3f   :  { %719 = vmatpush.bf16.msrb.mxu0 %v2041_v11  ;;  %v2232_v5 = vld [vmem:[#allocation6 + $0xd0] sm:$0xf0]  ;;  %v2285_v8 = vld [vmem:[#allocation8 + $0xb0] sm:$0xf0]  ;;  %v2156_v9 = vld [vmem:[#allocation8 + $0x90] sm:$0xf] }
  0x40   :  { %743 = vmatpush.bf16.msrb.mxu1 %v1913_v4  ;;  %v1853_v4 = vor.u32 %v2208_v1, %v1852_v0  ;;  %v1949_v6 = vor.u32 %v2232_v5, %v1948_v2  ;;  %v2282_v11 = vld [vmem:[#allocation8 + $0x98] sm:$0xf0]  ;;  %v2284_v12 = vld [vmem:[#allocation8 + $0xac] sm:$0xf]  ;;  %v2170_v13 = vld [vmem:[#allocation8 + $0xb4] sm:$0xf0] }
  0x41   :  { %772 = vmatpush.bf16.msrb.mxu3 %v2009_v10  ;;  %v2594_v10 = vor.u32 %v2285_v8, %v2168_v7  ;;  %v2596_v14 = vor.u32 %v2284_v12, %v2170_v13  ;;  %v2599_v15 = vor.u32 %v2282_v11, %v2156_v9  ;;  %v1832_v16 = vld [vmem:[#allocation3 + $0x48] sm:$0xf]  ;;  %v2203_v18 = vld [vmem:[#allocation3 + $0x4c] sm:$0xf]  ;;  %v1834_v19 = vld [vmem:[#allocation3 + $0x54] sm:$0xf0] }
  0x42   :  { %689 = vmatpush.bf16.msrb.mxu2 %v1957_v33  ;;  %v2605_v21 = vor.u32 %v2203_v18, %v1834_v19  ;;  %v2144_v22 = vld [vmem:[#allocation8 + $0x78] sm:$0xf]  ;;  %v2279_v23 = vld [vmem:[#allocation8 + $0x80] sm:$0xf0]  ;;  %v2281_v25 = vld [vmem:[#allocation8 + $0x94] sm:$0xf] }
  0x43   :  { %1019 = vmatpush.bf16.msra.mxu0 %v2594_v10  ;;  %v2611_v26 = vor.u32 %v2279_v23, %v2144_v22  ;;  %v2176_v29 = vld [vmem:[#allocation8 + $0xb0] sm:$0xf]  ;;  %v2286_v30 = vld [vmem:[#allocation8 + $0xb8] sm:$0xf0]  ;;  %v2132_v36 = vld [vmem:[#allocation8 + $0x60] sm:$0xf] }
  0x44   :  { %744 = vmatpush.bf16.msrb.mxu1 %v1901_v17  ;;  %v2204_v17 = vld [vmem:[#allocation3 + $0x50] sm:$0xf0]  ;;  %v2615_v33 = vor.u32 %v2286_v30, %v2176_v29  ;;  %v2068_v34 = vld [vmem:[#allocation6 + $0x1b8] sm:$0xf]  ;;  %v2262_v35 = vld [vmem:[#allocation6 + $0x1c0] sm:$0x30] }
  0x45   :  { %2072 = vmatmul.msk.bf16.gmra.mxu2 %vm544_vm1, %v2572_v24  ;;  %773 = vmatpush.bf16.msrb.mxu3 %v1997_v32  ;;  %v2603_v20 = vor.u32 %v2204_v17, %v1832_v16  ;;  %v2069_v37 = vor.u32 %v2262_v35, %v2068_v34  ;;  %v2276_v38 = vld [vmem:[#allocation8 + $0x68] sm:$0xf0]  ;;  %v2278_v39 = vld [vmem:[#allocation8 + $0x7c] sm:$0xf]  ;;  %v2164_v46 = vld [vmem:[#allocation8 + $0x98] sm:$0xf] }
  0x46   :  { %580 = vmatmul.bf16.gmra.mxu0 %v2574_v27  ;;  %690 = vmatpush.bf16.msrb.mxu2 %v1945_v43  ;;  %v2620_v42 = vor.u32 %v2276_v38, %v2132_v36  ;;  %v2283_v47 = vld [vmem:[#allocation8 + $0xa0] sm:$0xf0]  ;;  %v2056_v56 = vld [vmem:[#allocation6 + $0x1a0] sm:$0xf]  ;;  %v2152_v60 = vld [vmem:[#allocation8 + $0x80] sm:$0xf] }
  0x47   :  { %609 = vmatmul.bf16.gmra.mxu1 %v2576_v31  ;;  %1020 = vmatpush.bf16.msra.mxu0 %v2599_v15  ;;  %v2630_v49 = vor.u32 %v2283_v47, %v2164_v46  ;;  %v2275_v53 = vld [vmem:[#allocation8 + $0x64] sm:$0xf]  ;;  %v2280_v61 = vld [vmem:[#allocation8 + $0x88] sm:$0xf0]  ;;  %v2108_v0 = vld [vmem:[#allocation8 + $0x30] sm:$0xf] }
  0x48   :  { %745 = vmatpush.bf16.msrb.mxu1 %v1889_v28  ;;  %667 = vmatmul.bf16.gmra.mxu3 %v2574_v27  ;;  %v2158_v28 = vld [vmem:[#allocation8 + $0x9c] sm:$0xf0]  ;;  %v2259_v57 = vld [vmem:[#allocation6 + $0x1a8] sm:$0xf0]  ;;  %v2272_v1 = vld [vmem:[#allocation8 + $0x4c] sm:$0xf] }
  0x49   :  { %774 = vmatpush.bf16.msrb.mxu3 %v1985_v41  ;;  %v2613_v32 = vor.u32 %v2281_v25, %v2158_v28  ;;  %v2146_v41 = vld [vmem:[#allocation8 + $0x84] sm:$0xf0]  ;;  %v2057_v59 = vor.u32 %v2259_v57, %v2056_v56  ;;  %v2122_v2 = vld [vmem:[#allocation8 + $0x54] sm:$0xf0]  ;;  %v2256_v7 = vld [vmem:[#allocation6 + $0x190] sm:$0xf0] }
  0x4a   :  { %v2622_v43 = vor.u32 %v2278_v39, %v2146_v41  ;;  %v2645_v5 = vor.u32 %v2272_v1, %v2122_v2  ;;  %v2140_v9 = vld [vmem:[#allocation8 + $0x68] sm:$0xf]  ;;  %v2277_v11 = vld [vmem:[#allocation8 + $0x70] sm:$0xf0]  ;;  %v2096_v13 = vld [vmem:[#allocation8 + $0x18] sm:$0xf] }
  0x4b   :  { %1021 = vmatpush.bf16.msra.mxu0 %v2611_v26  ;;  %v2655_v12 = vor.u32 %v2277_v11, %v2140_v9  ;;  %v2267_v16 = vld [vmem:[#allocation8 + $0x20] sm:$0xf0]  ;;  %v2269_v17 = vld [vmem:[#allocation8 + $0x34] sm:$0xf]  ;;  %v2110_v19 = vld [vmem:[#allocation8 + $0x3c] sm:$0xf0] }
  0x4c   :  { %746 = vmatpush.bf16.msrb.mxu1 %v1877_v45  ;;  %v565_v45 = vsel %vm557_vm0, %v2069_v37, 0  ;;  %v2661_v18 = vor.u32 %v2267_v16, %v2096_v13  ;;  %v2128_v22 = vld [vmem:[#allocation8 + $0x50] sm:$0xf]  ;;  %v2274_v23 = vld [vmem:[#allocation8 + $0x58] sm:$0xf0]  ;;  %v2663_v25 = vor.u32 %v2269_v17, %v2110_v19 }
  0x4d   :  { %775 = vmatpush.bf16.msrb.mxu3 %v1973_v50  ;;  %804 = vmatpush.bf16.msra.mxu2 %v565_v45  ;;  %v2120_v50 = vld [vmem:[#allocation8 + $0x48] sm:$0xf]  ;;  %v2665_v28 = vor.u32 %v2274_v23, %v2128_v22  ;;  %v2084_v30 = vld [vmem:[#allocation8] sm:$0xf]  ;;  %v2264_v34 = vld [vmem:[#allocation8 + $0x8] sm:$0xf0] }
  0x4e   :  { %v2673_v35 = vor.u32 %v2264_v34, %v2084_v30  ;;  %v2263_v36 = vld [vmem:[#allocation8 + $0x4] sm:$0xf]  ;;  %v2086_v37 = vld [vmem:[#allocation8 + $0xc] sm:$0xf0]  ;;  %v2116_v39 = vld [vmem:[#allocation8 + $0x38] sm:$0xf] }
  0x4f   :  { %1022 = vmatpush.bf16.msra.mxu0 %v2620_v42  ;;  %v2678_v38 = vor.u32 %v2263_v36, %v2086_v37  ;;  %v2271_v41 = vld [vmem:[#allocation8 + $0x40] sm:$0xf0]  ;;  %v2104_v46 = vld [vmem:[#allocation8 + $0x20] sm:$0xf]  ;;  %v2268_v47 = vld [vmem:[#allocation8 + $0x28] sm:$0xf0] }
  0x50   :  { %747 = vmatpush.bf16.msrb.mxu1 %v1865_v52  ;;  %v2273_v52 = vld [vmem:[#allocation8 + $0x50] sm:$0xf0]  ;;  %v2688_v45 = vor.u32 %v2271_v41, %v2116_v39 }
  0x51   :  { %776 = vmatpush.bf16.msrb.mxu3 %v1961_v55  ;;  %v2635_v54 = vor.u32 %v2273_v52, %v2120_v50  ;;  %v2134_v55 = vld [vmem:[#allocation8 + $0x6c] sm:$0xf0]  ;;  %805 = vmatpush.bf16.msra.mxu2 %v2057_v59  ;;  %v2696_v50 = vor.u32 %v2268_v47, %v2104_v46 }
  0x52   :  { %v2637_v58 = vor.u32 %v2275_v53, %v2134_v55 }
  0x53   :  { %1023 = vmatpush.bf16.msra.mxu0 %v2635_v54 }
  0x54   :  { %748 = vmatpush.bf16.msrb.mxu1 %v1853_v4 }
  0x55   :  { %2073 = vmatmul.msk.bf16.gmra.mxu2 %vm544_vm1, %v2583_v62  ;;  %777 = vmatpush.bf16.msrb.mxu3 %v1949_v6  ;;  %v2044_v6 = vld [vmem:[#allocation6 + $0x188] sm:$0xf] }
  0x56   :  { %585 = vmatmul.bf16.gmra.mxu0 %v2585_v63  ;;  %v2045_v8 = vor.u32 %v2256_v7, %v2044_v6 }
  0x57   :  { %614 = vmatmul.bf16.gmra.mxu1 %v2587_v3 }
  0x58   :  { %672 = vmatmul.bf16.gmra.mxu3 %v2585_v63  ;;  %1032 = vmatpush.bf16.msra.mxu1 %v2596_v14 }
  0x59   :  { %1045 = vmatpush.bf16.msra.mxu3 %v2615_v33  ;;  %806 = vmatpush.bf16.msra.mxu2 %v2045_v8 }
  0x5c   :  { %1033 = vmatpush.bf16.msra.mxu1 %v2613_v32 }
  0x5d   :  { %1046 = vmatpush.bf16.msra.mxu3 %v2630_v49 }
  0x60   :  { %1034 = vmatpush.bf16.msra.mxu1 %v2622_v43 }
  0x64   :  { %1035 = vmatpush.bf16.msra.mxu1 %v2637_v58 }
  0x65   :  { %691 = vmatmul.bf16.vlgmr.msrb.gmra.mxu2 %v2565_v48 }
  0x66   :  { %590 = vmatmul.bf16.gmra.mxu0 %v2603_v20  ;;  %1210 = vmatpush.bf16.msrb.mxu2 %v2594_v10 }
  0x67   :  { %619 = vmatmul.bf16.gmra.mxu1 %v2605_v21 }
  0x68   :  { %677 = vmatmul.bf16.gmra.mxu3 %v2603_v20  ;;  %1036 = vmatpush.bf16.msra.mxu1 %v2645_v5 }
  0x6a   :  { %1211 = vmatpush.bf16.msrb.mxu2 %v2599_v15 }
  0x6c   :  { %1037 = vmatpush.bf16.msra.mxu1 %v2663_v25 }
  0x6e   :  { %1212 = vmatpush.bf16.msrb.mxu2 %v2611_v26 }
  0x72   :  { %1213 = vmatpush.bf16.msrb.mxu2 %v2620_v42 }
  0x75   :  { %696 = vmatmul.bf16.gmra.mxu2 %v2576_v31 }
  0x76   :  { %2074 = vmatmul.msk.bf16.vlgmr.msrb.gmra.mxu0 %vm544_vm1, %v2556_v51  ;;  %1214 = vmatpush.bf16.msrb.mxu2 %v2635_v54 }
  0x77   :  { %749 = vmatmul.bf16.vlgmr.msrb.gmra.mxu1 %v2563_v44  ;;  %v2640_v44 = vor.u32 %v2280_v61, %v2152_v60  ;;  %v2511_v60 = vmov 0  }
  0x78   :  { %778 = vmatmul.bf16.vlgmr.msrb.gmra.mxu3 %v2565_v48  ;;  %v2270_v48 = vld [vmem:[#allocation8 + $0x38] sm:$0xf0] }
  0x79   :  { %v2643_v4 = vor.u32 %v2270_v48, %v2108_v0  ;;  %1047 = vmatpush.bf16.msra.mxu3 %v2640_v44 }
  0x7b   :  { %1024 = vmatpush.bf16.msra.mxu0 %v2643_v4  ;;  %1215 = vmatpush.bf16.msrb.mxu2 %v2643_v4 }
  0x7d   :  { %1048 = vmatpush.bf16.msra.mxu3 %v2655_v12 }
  0x7f   :  { %1025 = vmatpush.bf16.msra.mxu0 %v2661_v18  ;;  %1216 = vmatpush.bf16.msrb.mxu2 %v2661_v18 }
  0x81   :  { %1049 = vmatpush.bf16.msra.mxu3 %v2665_v28 }
  0x83   :  { %1026 = vmatpush.bf16.msra.mxu0 %v2673_v35  ;;  %1217 = vmatpush.bf16.msrb.mxu2 %v2673_v35 }
  0x85   :  { %701 = vmatmul.bf16.gmra.mxu2 %v2587_v3  ;;  %1050 = vmatpush.bf16.msra.mxu3 %v2688_v45 }
  0x86   :  { %2075 = vmatmul.msk.bf16.gmra.mxu0 %vm544_vm1, %v2561_v40 }
  0x87   :  { %754 = vmatmul.bf16.gmra.mxu1 %v2574_v27  ;;  %v2266_v27 = vld [vmem:[#allocation8 + $0x1c] sm:$0xf]  ;;  %1116 = vmatpush.bf16.msrb.mxu0 %v2594_v10 }
  0x88   :  { %783 = vmatmul.bf16.gmra.mxu3 %v2576_v31  ;;  %v2098_v31 = vld [vmem:[#allocation8 + $0x24] sm:$0xf0] }
  0x89   :  { %v2671_v29 = vor.u32 %v2266_v27, %v2098_v31  ;;  %1051 = vmatpush.bf16.msra.mxu3 %v2696_v50 }
  0x8b   :  { %1038 = vmatpush.bf16.msra.mxu1 %v2671_v29  ;;  %1117 = vmatpush.bf16.msrb.mxu0 %v2599_v15 }
  0x8f   :  { %1039 = vmatpush.bf16.msra.mxu1 %v2678_v38  ;;  %1118 = vmatpush.bf16.msrb.mxu0 %v2611_v26 }
  0x93   :  { %1129 = vmatpush.bf16.msrb.mxu1 %v2596_v14  ;;  %1119 = vmatpush.bf16.msrb.mxu0 %v2620_v42 }
  0x95   :  { %706 = vmatmul.bf16.gmra.mxu2 %v2605_v21 }
  0x96   :  { %2076 = vmatmul.msk.bf16.gmra.mxu0 %vm544_vm1, %v2572_v24 }
  0x97   :  { %759 = vmatmul.bf16.gmra.mxu1 %v2585_v63  ;;  %v2092_v63 = vld [vmem:[#allocation8 + $0x8] sm:$0xf]  ;;  %1120 = vmatpush.bf16.msrb.mxu0 %v2635_v54 }
  0x98   :  { %788 = vmatmul.bf16.gmra.mxu3 %v2587_v3  ;;  %1130 = vmatpush.bf16.msrb.mxu1 %v2613_v32  ;;  %v2265_v3 = vld [vmem:[#allocation8 + $0x10] sm:$0xf0] }
  0x99   :  { %v2702_v52 = vor.u32 %v2265_v3, %v2092_v63 }
  0x9b   :  { %1052 = vmatpush.bf16.msra.mxu3 %v2702_v52  ;;  %1121 = vmatpush.bf16.msrb.mxu0 %v2643_v4 }
  0x9c   :  { %1131 = vmatpush.bf16.msrb.mxu1 %v2622_v43 }
  0x9f   :  { %1142 = vmatpush.bf16.msrb.mxu3 %v2615_v33  ;;  %1122 = vmatpush.bf16.msrb.mxu0 %v2661_v18 }
  0xa0   :  { %1132 = vmatpush.bf16.msrb.mxu1 %v2637_v58 }
  0xa3   :  { %1143 = vmatpush.bf16.msrb.mxu3 %v2630_v49  ;;  %1123 = vmatpush.bf16.msrb.mxu0 %v2673_v35 }
  0xa4   :  { %1133 = vmatpush.bf16.msrb.mxu1 %v2645_v5 }
  0xa5   :  { %2078 = vmatmul.msk.bf16.vlgmr.msra.gmra.mxu2 %vm544_vm1, %v2556_v51  ;;  %v2721_v51 = vld [vmem:[#allocation9] sm:$0x7] }
  0xa6   :  { %2077 = vmatmul.msk.bf16.gmra.mxu0 %vm544_vm1, %v2583_v62  ;;  %1317 = vmatpush.bf16.msra.mxu2 %v2596_v14  ;;  %v2775_v17 = vperm.slane %v2721_v51, 1 }
  0xa7   :  { %764 = vmatmul.bf16.gmra.mxu1 %v2603_v20  ;;  %1144 = vmatpush.bf16.msrb.mxu3 %v2640_v44 }
  0xa8   :  { %793 = vmatmul.bf16.gmra.mxu3 %v2605_v21  ;;  %v634_v53 = vpop.f32.mrf.mxu2  ;;  %1134 = vmatpush.bf16.msrb.mxu1 %v2663_v25  ;;  %v2728_v21 = vperm.slane %v2721_v51, 0 }
  0xaa   :  { %1318 = vmatpush.bf16.msra.mxu2 %v2613_v32 }
  0xab   :  { %1145 = vmatpush.bf16.msrb.mxu3 %v2655_v12 }
  0xac   :  { %1135 = vmatpush.bf16.msrb.mxu1 %v2671_v29 }
  0xae   :  { %1319 = vmatpush.bf16.msra.mxu2 %v2622_v43 }
  0xaf   :  { %1146 = vmatpush.bf16.msrb.mxu3 %v2665_v28 }
  0xb0   :  { %v2725_v20 = vpop.f32.mrf.mxu2  ;;  %1136 = vmatpush.bf16.msrb.mxu1 %v2678_v38 }
  0xb2   :  { %1320 = vmatpush.bf16.msra.mxu2 %v2637_v58 }
  0xb3   :  { %v576_v55 = vpop.f32.mrf.mxu0  ;;  %1147 = vmatpush.bf16.msrb.mxu3 %v2688_v45 }
  0xb4   :  { %v577_v56 = vadd.f32 %v576_v55, %v2728_v21  ;;  %v605_v57 = vpop.f32.mrf.mxu1 }
  0xb5   :  { %2079 = vmatmul.msk.bf16.gmra.mxu2 %vm544_vm1, %v2561_v40 }
  0xb6   :  { %v606_v59 = vadd.f32 %v605_v57, %v577_v56  ;;  %1027 = vmatmul.bf16.vlgmr.msra.gmra.mxu0 %v2511_v60  ;;  %1321 = vmatpush.bf16.msra.mxu2 %v2645_v5 }
  0xb7   :  { %1040 = vmatmul.bf16.vlgmr.msra.gmra.mxu1 %v2511_v60  ;;  %1223 = vmatpush.bf16.msra.mxu0 %v2596_v14 }
  0xb8   :  { %1053 = vmatmul.bf16.vlgmr.msra.gmra.mxu3 %v2511_v60  ;;  %v639_v61 = vpop.f32.mrf.mxu2  ;;  %v2739_v0 = vadd.f32 %v634_v53, %v606_v59  ;;  %1236 = vmatpush.bf16.msra.mxu1 %v2615_v33 }
  0xb9   :  { %1148 = vmatpush.bf16.msrb.mxu3 %v2696_v50 }
  0xba   :  { %1322 = vmatpush.bf16.msra.mxu2 %v2663_v25 }
  0xbb   :  { %v2744_v48 = vpop.f32.mrf.mxu3  ;;  %v2747_v40 = vpop.f32.mrf.mxu0  ;;  %1224 = vmatpush.bf16.msra.mxu0 %v2613_v32 }
  0xbc   :  { %v2749_v1 = vpop.f32.mrf.mxu1  ;;  %1237 = vmatpush.bf16.msra.mxu1 %v2630_v49 }
  0xbd   :  { %1149 = vmatpush.bf16.msrb.mxu3 %v2702_v52 }
  0xbe   :  { %1323 = vmatpush.bf16.msra.mxu2 %v2671_v29 }
  0xbf   :  { %1225 = vmatpush.bf16.msra.mxu0 %v2622_v43 }
  0xc0   :  { %v2755_v2 = vpop.f32.mrf.mxu2  ;;  %1238 = vmatpush.bf16.msra.mxu1 %v2640_v44 }
  0xc1   :  { %1304 = vmatpush.bf16.msra.mxu3 %v2594_v10 }
  0xc2   :  { %1324 = vmatpush.bf16.msra.mxu2 %v2678_v38 }
  0xc3   :  { %v2761_v6 = vpop.f32.mrf.mxu3  ;;  %v581_v7 = vpop.f32.mrf.mxu0  ;;  %1226 = vmatpush.bf16.msra.mxu0 %v2637_v58 }
  0xc4   :  { %v582_v8 = vadd.f32 %v581_v7, %v2728_v21  ;;  %v610_v9 = vpop.f32.mrf.mxu1  ;;  %1239 = vmatpush.bf16.msra.mxu1 %v2655_v12 }
  0xc5   :  { %2080 = vmatmul.msk.bf16.gmra.mxu2 %vm544_vm1, %v2572_v24  ;;  %1305 = vmatpush.bf16.msra.mxu3 %v2599_v15 }
  0xc6   :  { %v611_v11 = vadd.f32 %v610_v9, %v582_v8 }
  0xc7   :  { %1227 = vmatpush.bf16.msra.mxu0 %v2645_v5 }
  0xc8   :  { %v644_v13 = vpop.f32.mrf.mxu2  ;;  %v2772_v16 = vadd.f32 %v639_v61, %v611_v11  ;;  %1240 = vmatpush.bf16.msra.mxu1 %v2665_v28 }
  0xc9   :  { %1306 = vmatpush.bf16.msra.mxu3 %v2611_v26 }
  0xcb   :  { %v668_v19 = vpop.f32.mrf.mxu3  ;;  %v2780_v22 = vpop.f32.mrf.mxu0  ;;  %1228 = vmatpush.bf16.msra.mxu0 %v2663_v25 }
  0xcc   :  { %v669_v24 = vadd.f32 %v668_v19, %v2775_v17  ;;  %v2782_v23 = vpop.f32.mrf.mxu1  ;;  %1241 = vmatpush.bf16.msra.mxu1 %v2688_v45 }
  0xcd   :  { %1307 = vmatpush.bf16.msra.mxu3 %v2620_v42 }
  0xcf   :  { %1229 = vmatpush.bf16.msra.mxu0 %v2671_v29 }
  0xd0   :  { %v2787_v27 = vpop.f32.mrf.mxu2  ;;  %1242 = vmatpush.bf16.msra.mxu1 %v2696_v50 }
  0xd1   :  { %3054 = vst [vmem:[#allocation16_spill] sm:$0xff] %v2787_v27  ;;  %1308 = vmatpush.bf16.msra.mxu3 %v2635_v54 }
  0xd3   :  { %v670_v31 = vpop.f32.mrf.mxu3  ;;  %v586_v30 = vpop.f32.mrf.mxu0  ;;  %1230 = vmatpush.bf16.msra.mxu0 %v2678_v38 }
  0xd4   :  { %v587_v34 = vadd.f32 %v586_v30, %v2728_v21  ;;  %v615_v36 = vpop.f32.mrf.mxu1  ;;  %1243 = vmatpush.bf16.msra.mxu1 %v2702_v52 }
  0xd5   :  { %2081 = vmatmul.msk.bf16.gmra.mxu2 %vm544_vm1, %v2583_v62  ;;  %1309 = vmatpush.bf16.msra.mxu3 %v2643_v4 }
  0xd6   :  { %v616_v37 = vadd.f32 %v615_v36, %v587_v34 }
  0xd8   :  { %v649_v39 = vpop.f32.mrf.mxu2  ;;  %v2798_v41 = vadd.f32 %v644_v13, %v616_v37  ;;  %v664_v37 = vadd.f32 %v2744_v48, %v2775_v17 }
  0xd9   :  { %1310 = vmatpush.bf16.msra.mxu3 %v2661_v18 }
  0xda   :  { %3055 = vst [vmem:[#allocation17_spill] sm:$0xff] %v2798_v41 }
  0xdb   :  { %v673_v46 = vpop.f32.mrf.mxu3  ;;  %v588_v63 = vpop.f32.mrf.mxu0 }
  0xdc   :  { %v674_v47 = vadd.f32 %v673_v46, %v2775_v17  ;;  %v589_v3 = vadd.f32 %v588_v63, %v2728_v21  ;;  %v617_v53 = vpop.f32.mrf.mxu1 }
  0xdd   :  { %1311 = vmatpush.bf16.msra.mxu3 %v2673_v35 }
  0xde   :  { %v2803_v55 = vadd.f32 %v617_v53, %v589_v3 }
  0xe0   :  { %3056 = vst [vmem:[#allocation18_spill] sm:$0xff] %v2803_v55  ;;  %v2806_v62 = vpop.f32.mrf.mxu2 }
  0xe1   :  { %3057 = vst [vmem:[#allocation19_spill] sm:$0xff] %v2806_v62 }
  0xe3   :  { %v675_v56 = vpop.f32.mrf.mxu3  ;;  %v591_v59 = vpop.f32.mrf.mxu0 }
  0xe4   :  { %v676_v57 = vadd.f32 %v675_v56, %v2775_v17  ;;  %v592_v60 = vadd.f32 %v591_v59, %v2728_v21  ;;  %v620_v61 = vpop.f32.mrf.mxu1 }
  0xe6   :  { %v621_v7 = vadd.f32 %v620_v61, %v592_v60 }
  0xe8   :  { %v692_v8 = vpop.f32.mrf.mxu2  ;;  %v2810_v9 = vadd.f32 %v649_v39, %v621_v7  ;;  %v179_v39 = vperm.slane %v2721_v51, 2  ;;  %v666_v7 = vadd.f32 %v2761_v6, %v2775_v17  ;;  %v671_v51 = vadd.f32 %v670_v31, %v2775_v17 }
  0xe9   :  { %v693_v63 = vadd.f32 %v692_v8, %v664_v37 }
  0xea   :  { %3058 = vst [vmem:[#allocation20_spill] sm:$0xff] %v2810_v9 }
  0xeb   :  { %v678_v11 = vpop.f32.mrf.mxu3  ;;  %v593_v19 = vpop.f32.mrf.mxu0 }
  0xec   :  { %v679_v13 = vadd.f32 %v678_v11, %v2775_v17  ;;  %v594_v30 = vadd.f32 %v593_v19, %v2728_v21  ;;  %v622_v34 = vpop.f32.mrf.mxu1 }
  0xee   :  { %v2814_v36 = vadd.f32 %v622_v34, %v594_v30 }
  0xf0   :  { %3059 = vst [vmem:[#allocation21_spill] sm:$0xff] %v2814_v36  ;;  %v694_v46 = vpop.f32.mrf.mxu2 }
  0xf1   :  { %v695_v30 = vadd.f32 %v694_v46, %v666_v7 }
  0xf3   :  { %v680_v3 = vpop.f32.mrf.mxu3  ;;  %v721_v56 = vpop.f32.mrf.mxu0 }
  0xf4   :  { %v681_v53 = vadd.f32 %v680_v3, %v2775_v17  ;;  %v2820_v59 = vadd.f32 %v721_v56, %v693_v63  ;;  %v750_v60 = vpop.f32.mrf.mxu1 }
  0xf5   :  { %v751_v61 = vadd.f32 %v750_v60, %v179_v39 }
  0xf8   :  { %v697_v11 = vpop.f32.mrf.mxu2 }
  0xf9   :  { %v698_v19 = vadd.f32 %v697_v11, %v669_v24 }
  0xfb   :  { %v779_v34 = vpop.f32.mrf.mxu3  ;;  %v723_v8 = vpop.f32.mrf.mxu0 }
  0xfc   :  { %v2824_v48 = vadd.f32 %v779_v34, %v751_v61  ;;  %v2826_v37 = vadd.f32 %v723_v8, %v695_v30  ;;  %v752_v3 = vpop.f32.mrf.mxu1 }
  0xfd   :  { %v753_v62 = vadd.f32 %v752_v3, %v179_v39 }
 0x100   :  { %v699_v63 = vpop.f32.mrf.mxu2 }
 0x101   :  { %v700_v56 = vadd.f32 %v699_v63, %v671_v51 }
 0x103   :  { %v781_v36 = vpop.f32.mrf.mxu3  ;;  %v726_v9 = vpop.f32.mrf.mxu0 }
 0x104   :  { %v2829_v60 = vadd.f32 %v781_v36, %v753_v62  ;;  %v2831_v6 = vadd.f32 %v726_v9, %v698_v19  ;;  %v755_v24 = vpop.f32.mrf.mxu1 }
 0x105   :  { %v756_v46 = vadd.f32 %v755_v24, %v179_v39 }
 0x108   :  { %v702_v7 = vpop.f32.mrf.mxu2 }
 0x109   :  { %v703_v61 = vadd.f32 %v702_v7, %v674_v47 }
 0x10b   :  { %v784_v11 = vpop.f32.mrf.mxu3  ;;  %v728_v30 = vpop.f32.mrf.mxu0 }
 0x10c   :  { %v785_v34 = vadd.f32 %v784_v11, %v756_v46  ;;  %v2833_v8 = vadd.f32 %v728_v30, %v700_v56  ;;  %v757_v3 = vpop.f32.mrf.mxu1 }
 0x10d   :  { %v758_v27 = vadd.f32 %v757_v3, %v179_v39 }
 0x10e   :  { %3060 = vst [vmem:[#allocation22_spill] sm:$0xff] %v2833_v8 }
 0x110   :  { %v704_v17 = vpop.f32.mrf.mxu2 }
 0x111   :  { %v705_v31 = vadd.f32 %v704_v17, %v676_v57 }
 0x113   :  { %v786_v51 = vpop.f32.mrf.mxu3  ;;  %v731_v62 = vpop.f32.mrf.mxu0 }
 0x114   :  { %v787_v63 = vadd.f32 %v786_v51, %v758_v27  ;;  %v2835_v36 = vadd.f32 %v731_v62, %v703_v61  ;;  %v760_v9 = vpop.f32.mrf.mxu1 }
 0x115   :  { %v761_v19 = vadd.f32 %v760_v9, %v179_v39 }
 0x116   :  { %3061 = vst [vmem:[#allocation23_spill] sm:$0xff] %v2835_v36 }
 0x118   :  { %v707_v55 = vpop.f32.mrf.mxu2 }
 0x119   :  { %v708_v24 = vadd.f32 %v707_v55, %v679_v13 }
 0x11b   :  { %v789_v41 = vpop.f32.mrf.mxu3  ;;  %v733_v7 = vpop.f32.mrf.mxu0 }
 0x11c   :  { %v790_v47 = vadd.f32 %v789_v41, %v761_v19  ;;  %v2837_v46 = vadd.f32 %v733_v7, %v705_v31  ;;  %v762_v56 = vpop.f32.mrf.mxu1 }
 0x11d   :  { %v763_v11 = vadd.f32 %v762_v56, %v179_v39 }
 0x11e   :  { %3062 = vst [vmem:[#allocation24_spill] sm:$0xff] %v2837_v46 }
 0x120   :  { %v709_v30 = vpop.f32.mrf.mxu2 }
 0x121   :  { %v710_v3 = vadd.f32 %v709_v30, %v681_v53 }
 0x123   :  { %v791_v8 = vpop.f32.mrf.mxu3  ;;  %v736_v17 = vpop.f32.mrf.mxu0 }
 0x124   :  { %v792_v57 = vadd.f32 %v791_v8, %v763_v11  ;;  %v2839_v27 = vadd.f32 %v736_v17, %v708_v24  ;;  %v765_v61 = vpop.f32.mrf.mxu1 }
 0x125   :  { %v766_v51 = vadd.f32 %v765_v61, %v179_v39 }
 0x126   :  { %3063 = vst [vmem:[#allocation25_spill] sm:$0xff] %v2839_v27 }
 0x128   :  { %v808_v62 = vpop.f32.mrf.mxu2 }
 0x12b   :  { %v794_v9 = vpop.f32.mrf.mxu3  ;;  %v738_v55 = vpop.f32.mrf.mxu0 }
 0x12c   :  { %v2841_v36 = vadd.f32 %v794_v9, %v766_v51  ;;  %v2843_v41 = vadd.f32 %v738_v55, %v710_v3  ;;  %v767_v13 = vpop.f32.mrf.mxu1 }
 0x12d   :  { %v768_v31 = vadd.f32 %v767_v13, %v179_v39 }
 0x12e   :  { %3064 = vst [vmem:[#allocation26_spill] sm:$0xff] %v2843_v41 }
 0x130   :  { %v2845_v19 = vpop.f32.mrf.mxu2 }
 0x133   :  { %v796_v7 = vpop.f32.mrf.mxu3  ;;  %v1028_v8 = vpop.f32.mrf.mxu0 }
 0x134   :  { %v2847_v53 = vadd.f32 %v796_v7, %v768_v31  ;;  %v1058_v24 = vadd.f32 %v1028_v8, %v2739_v0  ;;  %v1041_v56 = vpop.f32.mrf.mxu1 }
 0x135   :  { %v1078_v11 = vadd.f32 %v1041_v56, %v2820_v59 }
 0x136   :  { %3065 = vst [vmem:[#allocation27_spill] sm:$0xff] %v2847_v53  ;;  %v2178_v30 = vmul.f32 -1.442695, %v1058_v24 }
 0x137   :  { %v2179_v17 = vmul.f32 -1.442695, %v1078_v11 }
 0x138   :  { %2296 = vpow2.f32 %v2178_v30  ;;  %v813_v61 = vpop.f32.mrf.mxu2 }
 0x139   :  { %2298 = vpow2.f32 %v2179_v17  ;;  %v2851_v3 = vadd.f32 %v813_v61, %v785_v34  ;;  %v2860_v61 = vld [vmem:[%s3052_s4] ss:$0 sm:$0xff] }
 0x13b   :  { %v1054_v51 = vpop.f32.mrf.mxu3  ;;  %v1030_v39 = vpop.f32.mrf.mxu0 }
 0x13c   :  { %v1043_v9 = vpop.f32.mrf.mxu1 }
 0x13e   :  { %v2297_v55 = vpop.eup %2296 }
 0x13f   :  { %v2299_v13 = vpop.eup %2298  ;;  %v1062_v31 = vadd.f32 1.0, %v2297_v55 }
 0x140   :  { %v1082_v7 = vadd.f32 1.0, %v2299_v13  ;;  %v815_v53 = vpop.f32.mrf.mxu2 }
 0x141   :  { %2300 = vrcp.f32 %v1062_v31  ;;  %v2853_v0 = vadd.f32 %v815_v53, %v787_v63  ;;  %v1074_v9 = vand.u32 2147483648, %v1062_v31  ;;  %v1072_v63 = vand.u32 2147483647, %v1062_v31 }
 0x142   :  { %2302 = vrcp.f32 %v1082_v7  ;;  %vm1068_vm3 = vweird.f32 %v1062_v31  ;;  %vm1088_vm7 = vweird.f32 %v1082_v7 }
 0x143   :  { %v1056_v59 = vpop.f32.mrf.mxu3  ;;  %v1075_v41 = vor.u32 1.1754944e-38, %v1074_v9  ;;  %vm1073_vm5 = vcmp.eq.f32.partialorder %v1072_v63, 8.507059e+37 }
 0x144   :  { %v1101_v59 = vadd.f32 %v2860_v61, %v1054_v51 }
 0x147   :  { %v2301_v8 = vpop.eup %2300 }
 0x148   :  { %v2303_v24 = vpop.eup %2302  ;;  %v818_v56 = vpop.f32.mrf.mxu2  ;;  %v1064_v11 = vmul.f32 %v2301_v8, %v1062_v31  ;;  %vm1069_vm2 = vweird.f32 %v2301_v8 }
 0x149   :  { %v1084_v30 = vmul.f32 %v2303_v24, %v1082_v7  ;;  %v2855_v34 = vadd.f32 %v818_v56, %v790_v47  ;;  %vm1070_vm4 = vmor %vm1068_vm3, %vm1069_vm2  ;;  %vm1089_vm6 = vweird.f32 %v2303_v24 }
 0x14a   :  { %v1065_v17 = vsub.f32 1.0, %v1064_v11  ;;  %vm1090_vm8 = vmor %vm1088_vm7, %vm1089_vm6 }
 0x14b   :  { %3066 = vst [vmem:[#allocation28_spill] sm:$0xff] %v2855_v34  ;;  %v1085_v39 = vsub.f32 1.0, %v1084_v30  ;;  %v809_v30 = vadd.f32 %v808_v62, %v2824_v48 }
 0x14c   :  { %v1066_v55 = vmul.f32 %v2301_v8, %v1065_v17  ;;  %v1094_v17 = vand.u32 2147483648, %v1082_v7 }
 0x14d   :  { %v1086_v53 = vmul.f32 %v2303_v24, %v1085_v39  ;;  %v1092_v39 = vand.u32 2147483647, %v1082_v7 }
 0x14e   :  { %v1067_v13 = vadd.f32 %v2301_v8, %v1066_v55  ;;  %v1095_v51 = vor.u32 1.1754944e-38, %v1094_v17 }
 0x14f   :  { %v1087_v46 = vadd.f32 %v2303_v24, %v1086_v53  ;;  %vm1093_vm9 = vcmp.eq.f32.partialorder %v1092_v39, 8.507059e+37 }
 0x150   :  { %v1071_v47 = vsel %vm1070_vm4, %v2301_v8, %v1067_v13  ;;  %v820_v56 = vpop.f32.mrf.mxu2 }
 0x151   :  { %v1076_v11 = vsel %vm1073_vm5, %v1075_v41, %v1071_v47  ;;  %v2863_v27 = vadd.f32 %v820_v56, %v792_v57  ;;  %v1091_v55 = vsel %vm1090_vm8, %v2303_v24, %v1087_v46 }
 0x152   :  { %v1102_v34 = vmul.f32 %v1101_v59, %v1076_v11  ;;  %v1096_v9 = vsel %vm1093_vm9, %v1095_v51, %v1091_v55 }
 0x153   :  { %v1105_v57 = vsub.f32 1.0, %v1096_v9  ;;  %v1107_v13 = vmul.f32 0.0, %v1096_v9 }
 0x154   :  { %v1103_v31 = vadd.f32 %v1102_v34, %v809_v30 }
 0x156   :  { %2304 = vtanh.f32 %v1103_v31 }
 0x158   :  { %v823_v8 = vpop.f32.mrf.mxu2 }
 0x159   :  { %v2867_v63 = vadd.f32 %v823_v8, %v2841_v36  ;;  %v579_v36 = vadd.f32 %v2747_v40, %v2728_v21 }
 0x15b   :  { %v608_v46 = vadd.f32 %v2749_v1, %v579_v36 }
 0x15c   :  { %v2305_v41 = vpop.eup %2304 }
 0x15d   :  { %v1106_v53 = vmul.f32 %v2305_v41, %v1105_v57  ;;  %v637_v7 = vadd.f32 %v2725_v20, %v608_v46 }
 0x15f   :  { %v2869_v48 = vadd.f32 %v1107_v13, %v1106_v53 }
 0x161   :  { %v1115_v62 = vpack.c.bf16 %v2869_v48, %v2869_v48 }
 0x163   :  { %1124 = vmatmul.bf16.vlgmr.msrb.gmra.mxu0 %v1115_v62  ;;  %1137 = vmatmul.bf16.vlgmr.msrb.gmra.mxu1 %v1115_v62 }
 0x164   :  { %1150 = vmatmul.bf16.vlgmr.msrb.gmra.mxu3 %v1115_v62  ;;  %1330 = vmatpush.bf16.msrb.mxu0 %v2615_v33 }
 0x165   :  { %1398 = vmatpush.bf16.msrb.mxu1 %v2594_v10  ;;  %1411 = vmatpush.bf16.msrb.mxu3 %v2596_v14 }
 0x168   :  { %1331 = vmatpush.bf16.msrb.mxu0 %v2630_v49 }
 0x169   :  { %1399 = vmatpush.bf16.msrb.mxu1 %v2599_v15  ;;  %1412 = vmatpush.bf16.msrb.mxu3 %v2613_v32 }
 0x16c   :  { %1332 = vmatpush.bf16.msrb.mxu0 %v2640_v44 }
 0x16d   :  { %1400 = vmatpush.bf16.msrb.mxu1 %v2611_v26  ;;  %1413 = vmatpush.bf16.msrb.mxu3 %v2622_v43 }
 0x170   :  { %1333 = vmatpush.bf16.msrb.mxu0 %v2655_v12 }
 0x171   :  { %1401 = vmatpush.bf16.msrb.mxu1 %v2620_v42  ;;  %1414 = vmatpush.bf16.msrb.mxu3 %v2637_v58 }
 0x174   :  { %1334 = vmatpush.bf16.msrb.mxu0 %v2665_v28 }
 0x175   :  { %1402 = vmatpush.bf16.msrb.mxu1 %v2635_v54  ;;  %1415 = vmatpush.bf16.msrb.mxu3 %v2645_v5 }
 0x178   :  { %1335 = vmatpush.bf16.msrb.mxu0 %v2688_v45 }
 0x179   :  { %1403 = vmatpush.bf16.msrb.mxu1 %v2643_v4  ;;  %1416 = vmatpush.bf16.msrb.mxu3 %v2663_v25 }
 0x17c   :  { %1336 = vmatpush.bf16.msrb.mxu0 %v2696_v50 }
 0x17d   :  { %1404 = vmatpush.bf16.msrb.mxu1 %v2661_v18  ;;  %1417 = vmatpush.bf16.msrb.mxu3 %v2671_v29 }
 0x180   :  { %1337 = vmatpush.bf16.msrb.mxu0 %v2702_v52 }
 0x181   :  { %1405 = vmatpush.bf16.msrb.mxu1 %v2673_v35  ;;  %1418 = vmatpush.bf16.msrb.mxu3 %v2678_v38 }
 0x1e0   :  { %v1125_v24 = vpop.f32.mrf.mxu0  ;;  %v1138_v34 = vpop.f32.mrf.mxu1 }
 0x1e1   :  { %v1155_v59 = vadd.f32 %v1125_v24, %v637_v7  ;;  %v1175_v47 = vadd.f32 %v1138_v34, %v2826_v37 }
 0x1e3   :  { %v2180_v56 = vmul.f32 -1.442695, %v1155_v59  ;;  %v2181_v11 = vmul.f32 -1.442695, %v1175_v47 }
 0x1e5   :  { %2306 = vpow2.f32 %v2180_v56  ;;  %v811_v56 = vadd.f32 %v2845_v19, %v2829_v60  ;;  %v2934_v19 = vpop.f32.mrf.mxu2 }
 0x1e6   :  { %2308 = vpow2.f32 %v2181_v11 }
 0x1e7   :  { %v1151_v30 = vpop.f32.mrf.mxu3 }
 0x1e8   :  { %v1127_v17 = vpop.f32.mrf.mxu0  ;;  %v1140_v39 = vpop.f32.mrf.mxu1  ;;  %v1195_v34 = vadd.f32 %v2860_v61, %v1151_v30 }
 0x1eb   :  { %v2307_v31 = vpop.eup %2306 }
 0x1ec   :  { %v2309_v55 = vpop.eup %2308  ;;  %v1159_v51 = vadd.f32 1.0, %v2307_v31 }
 0x1ed   :  { %v1179_v40 = vadd.f32 1.0, %v2309_v55 }
 0x1ee   :  { %2310 = vrcp.f32 %v1159_v51  ;;  %v1171_v53 = vand.u32 2147483648, %v1159_v51  ;;  %v1169_v62 = vand.u32 2147483647, %v1159_v51  ;;  %vm1165_vm11 = vweird.f32 %v1159_v51 }
 0x1ef   :  { %2312 = vrcp.f32 %v1179_v40  ;;  %v1153_v1 = vpop.f32.mrf.mxu3  ;;  %v1191_v11 = vand.u32 2147483648, %v1179_v40  ;;  %vm1185_vm15 = vweird.f32 %v1179_v40  ;;  %v1189_v39 = vand.u32 2147483647, %v1179_v40 }
 0x1f0   :  { %v1172_v7 = vor.u32 1.1754944e-38, %v1171_v53  ;;  %vm1170_vm13 = vcmp.eq.f32.partialorder %v1169_v62, 8.507059e+37 }
 0x1f1   :  { %vm1190_vm1 = vcmp.eq.f32.partialorder %v1189_v39, 8.507059e+37 }
 0x1f4   :  { %v2311_v20 = vpop.eup %2310 }
 0x1f5   :  { %v2313_v8 = vpop.eup %2312  ;;  %v1161_v9 = vmul.f32 %v2311_v20, %v1159_v51  ;;  %vm1166_vm10 = vweird.f32 %v2311_v20  ;;  %v1192_v51 = vor.u32 1.1754944e-38, %v1191_v11 }
 0x1f6   :  { %v1181_v57 = vmul.f32 %v2313_v8, %v1179_v40  ;;  %vm1167_vm12 = vmor %vm1165_vm11, %vm1166_vm10  ;;  %vm1186_vm14 = vweird.f32 %v2313_v8 }
 0x1f7   :  { %v1162_v41 = vsub.f32 1.0, %v1161_v9  ;;  %vm1187_vm0 = vmor %vm1185_vm15, %vm1186_vm14 }
 0x1f8   :  { %v1182_v37 = vsub.f32 1.0, %v1181_v57 }
 0x1f9   :  { %v1163_v13 = vmul.f32 %v2311_v20, %v1162_v41 }
 0x1fa   :  { %v1183_v36 = vmul.f32 %v2313_v8, %v1182_v37 }
 0x1fb   :  { %v1164_v46 = vadd.f32 %v2311_v20, %v1163_v13 }
 0x1fc   :  { %v1184_v59 = vadd.f32 %v2313_v8, %v1183_v36 }
 0x1fd   :  { %v1168_v24 = vsel %vm1167_vm12, %v2311_v20, %v1164_v46 }
 0x1fe   :  { %v1173_v47 = vsel %vm1170_vm13, %v1172_v7, %v1168_v24  ;;  %v1188_v55 = vsel %vm1187_vm0, %v2313_v8, %v1184_v59 }
 0x1ff   :  { %v1196_v17 = vmul.f32 %v1195_v34, %v1173_v47  ;;  %v1193_v1 = vsel %vm1190_vm1, %v1192_v51, %v1188_v55 }
 0x200   :  { %v1199_v20 = vsub.f32 1.0, %v1193_v1  ;;  %v1201_v57 = vmul.f32 %v1193_v1, %v2869_v48 }
 0x201   :  { %v1197_v31 = vadd.f32 %v1196_v17, %v811_v56 }
 0x203   :  { %2314 = vtanh.f32 %v1197_v31 }
 0x209   :  { %v2315_v9 = vpop.eup %2314 }
 0x20a   :  { %v1200_v30 = vmul.f32 %v2315_v9, %v1199_v20 }
 0x20c   :  { %v2906_v41 = vadd.f32 %v1201_v57, %v1200_v30 }
 0x20e   :  { %v1209_v60 = vpack.c.bf16 %v2906_v41, %v2906_v41 }
 0x210   :  { %1218 = vmatmul.bf16.vlgmr.msrb.gmra.mxu2 %v1209_v60  ;;  %1231 = vmatmul.bf16.vlgmr.msra.gmra.mxu0 %v1209_v60 }
 0x211   :  { %1244 = vmatmul.bf16.vlgmr.msra.gmra.mxu1 %v1209_v60  ;;  %1424 = vmatpush.bf16.msrb.mxu2 %v2615_v33 }
 0x212   :  { %1492 = vmatpush.bf16.msra.mxu0 %v2594_v10  ;;  %1505 = vmatpush.bf16.msra.mxu1 %v2596_v14 }
 0x215   :  { %1425 = vmatpush.bf16.msrb.mxu2 %v2630_v49 }
 0x216   :  { %1493 = vmatpush.bf16.msra.mxu0 %v2599_v15  ;;  %1506 = vmatpush.bf16.msra.mxu1 %v2613_v32 }
 0x219   :  { %1426 = vmatpush.bf16.msrb.mxu2 %v2640_v44 }
 0x21a   :  { %1494 = vmatpush.bf16.msra.mxu0 %v2611_v26  ;;  %1507 = vmatpush.bf16.msra.mxu1 %v2622_v43 }
 0x21d   :  { %1427 = vmatpush.bf16.msrb.mxu2 %v2655_v12 }
 0x21e   :  { %1495 = vmatpush.bf16.msra.mxu0 %v2620_v42  ;;  %1508 = vmatpush.bf16.msra.mxu1 %v2637_v58 }
 0x221   :  { %1428 = vmatpush.bf16.msrb.mxu2 %v2665_v28 }
 0x222   :  { %1496 = vmatpush.bf16.msra.mxu0 %v2635_v54  ;;  %1509 = vmatpush.bf16.msra.mxu1 %v2645_v5 }
 0x225   :  { %1429 = vmatpush.bf16.msrb.mxu2 %v2688_v45 }
 0x226   :  { %1497 = vmatpush.bf16.msra.mxu0 %v2643_v4  ;;  %1510 = vmatpush.bf16.msra.mxu1 %v2663_v25 }
 0x229   :  { %1430 = vmatpush.bf16.msrb.mxu2 %v2696_v50 }
 0x22a   :  { %1498 = vmatpush.bf16.msra.mxu0 %v2661_v18  ;;  %1511 = vmatpush.bf16.msra.mxu1 %v2671_v29 }
 0x22d   :  { %1431 = vmatpush.bf16.msrb.mxu2 %v2702_v52 }
 0x22e   :  { %1499 = vmatpush.bf16.msra.mxu0 %v2673_v35  ;;  %1512 = vmatpush.bf16.msra.mxu1 %v2678_v38 }
 0x28d   :  { %v1232_v48 = vpop.f32.mrf.mxu0 }
 0x28e   :  { %v1269_v40 = vadd.f32 %v1232_v48, %v2831_v6  ;;  %v1245_v8 = vpop.f32.mrf.mxu1 }
 0x28f   :  { %v1289_v30 = vadd.f32 %v2860_v61, %v1245_v8 }
 0x290   :  { %v2183_v37 = vmul.f32 -1.442695, %v1269_v40 }
 0x292   :  { %2316 = vpow2.f32 %v2183_v37 }
 0x293   :  { %v1219_v53 = vpop.f32.mrf.mxu2 }
 0x294   :  { %v1249_v13 = vadd.f32 %v1219_v53, %v2772_v16 }
 0x295   :  { %v1234_v62 = vpop.f32.mrf.mxu0 }
 0x296   :  { %v2182_v36 = vmul.f32 -1.442695, %v1249_v13  ;;  %v1247_v46 = vpop.f32.mrf.mxu1 }
 0x298   :  { %v2317_v7 = vpop.eup %2316  ;;  %2318 = vpow2.f32 %v2182_v36 }
 0x299   :  { %v1273_v24 = vadd.f32 1.0, %v2317_v7 }
 0x29b   :  { %v1221_v34 = vpop.f32.mrf.mxu2  ;;  %2320 = vrcp.f32 %v1273_v24  ;;  %v1285_v40 = vand.u32 2147483648, %v1273_v24  ;;  %vm1279_vm7 = vweird.f32 %v1273_v24  ;;  %v1283_v53 = vand.u32 2147483647, %v1273_v24 }
 0x29d   :  { %v1286_v36 = vor.u32 1.1754944e-38, %v1285_v40  ;;  %vm1284_vm9 = vcmp.eq.f32.partialorder %v1283_v53, 8.507059e+37 }
 0x29e   :  { %v2319_v59 = vpop.eup %2318 }
 0x29f   :  { %v1253_v47 = vadd.f32 1.0, %v2319_v59 }
 0x2a1   :  { %2322 = vrcp.f32 %v1253_v47  ;;  %v2321_v56 = vpop.eup %2320  ;;  %v1265_v55 = vand.u32 2147483648, %v1253_v47  ;;  %v1263_v16 = vand.u32 2147483647, %v1253_v47  ;;  %vm1259_vm3 = vweird.f32 %v1253_v47 }
 0x2a2   :  { %v1275_v11 = vmul.f32 %v2321_v56, %v1273_v24  ;;  %vm1280_vm6 = vweird.f32 %v2321_v56 }
 0x2a3   :  { %v1266_v9 = vor.u32 1.1754944e-38, %v1265_v55  ;;  %vm1264_vm5 = vcmp.eq.f32.partialorder %v1263_v16, 8.507059e+37  ;;  %vm1281_vm8 = vmor %vm1279_vm7, %vm1280_vm6 }
 0x2a4   :  { %v1276_v39 = vsub.f32 1.0, %v1275_v11 }
 0x2a6   :  { %v1277_v1 = vmul.f32 %v2321_v56, %v1276_v39 }
 0x2a7   :  { %v2323_v6 = vpop.eup %2322 }
 0x2a8   :  { %v1255_v17 = vmul.f32 %v2323_v6, %v1253_v47  ;;  %vm1260_vm2 = vweird.f32 %v2323_v6  ;;  %v1278_v48 = vadd.f32 %v2321_v56, %v1277_v1 }
 0x2a9   :  { %vm1261_vm4 = vmor %vm1259_vm3, %vm1260_vm2 }
 0x2aa   :  { %v1256_v31 = vsub.f32 1.0, %v1255_v17  ;;  %v1282_v62 = vsel %vm1281_vm8, %v2321_v56, %v1278_v48 }
 0x2ab   :  { %v1287_v46 = vsel %vm1284_vm9, %v1286_v36, %v1282_v62 }
 0x2ac   :  { %v1257_v51 = vmul.f32 %v2323_v6, %v1256_v31  ;;  %v1293_v7 = vsub.f32 1.0, %v1287_v46  ;;  %v1295_v59 = vmul.f32 %v1287_v46, %v2906_v41  ;;  %v3067_v31 = vld [vmem:[#allocation22_spill] sm:$0xff] }
 0x2ae   :  { %v1258_v20 = vadd.f32 %v2323_v6, %v1257_v51 }
 0x2b0   :  { %v1262_v57 = vsel %vm1261_vm4, %v2323_v6, %v1258_v20 }
 0x2b1   :  { %v1267_v60 = vsel %vm1264_vm5, %v1266_v9, %v1262_v57 }
 0x2b2   :  { %v1290_v37 = vmul.f32 %v1289_v30, %v1267_v60 }
 0x2b4   :  { %v1291_v13 = vadd.f32 %v1290_v37, %v2851_v3  ;;  %v584_v3 = vadd.f32 %v2780_v22, %v2728_v21 }
 0x2b6   :  { %2324 = vtanh.f32 %v1291_v13  ;;  %v613_v41 = vadd.f32 %v2782_v23, %v584_v3 }
 0x2b8   :  { %v642_v56 = vadd.f32 %v2755_v2, %v613_v41 }
 0x2bc   :  { %v2325_v34 = vpop.eup %2324 }
 0x2bd   :  { %v1294_v8 = vmul.f32 %v2325_v34, %v1293_v7 }
 0x2bf   :  { %v2941_v47 = vadd.f32 %v1295_v59, %v1294_v8 }
 0x2c1   :  { %v1303_v11 = vpack.c.bf16 %v2941_v47, %v2941_v47 }
 0x2c3   :  { %1312 = vmatmul.bf16.vlgmr.msra.gmra.mxu3 %v1303_v11  ;;  %1325 = vmatmul.bf16.vlgmr.msra.gmra.mxu2 %v1303_v11 }
 0x2c4   :  { %1338 = vmatmul.bf16.vlgmr.msrb.gmra.mxu0 %v1303_v11  ;;  %1518 = vmatpush.bf16.msra.mxu3 %v2615_v33 }
 0x2c5   :  { %1586 = vmatpush.bf16.msra.mxu2 %v2594_v10  ;;  %1599 = vmatpush.bf16.msrb.mxu0 %v2596_v14 }
 0x2c8   :  { %1519 = vmatpush.bf16.msra.mxu3 %v2630_v49 }
 0x2c9   :  { %1587 = vmatpush.bf16.msra.mxu2 %v2599_v15  ;;  %1600 = vmatpush.bf16.msrb.mxu0 %v2613_v32 }
 0x2cc   :  { %1520 = vmatpush.bf16.msra.mxu3 %v2640_v44 }
 0x2cd   :  { %1588 = vmatpush.bf16.msra.mxu2 %v2611_v26  ;;  %1601 = vmatpush.bf16.msrb.mxu0 %v2622_v43 }
 0x2d0   :  { %1521 = vmatpush.bf16.msra.mxu3 %v2655_v12 }
 0x2d1   :  { %1589 = vmatpush.bf16.msra.mxu2 %v2620_v42  ;;  %1602 = vmatpush.bf16.msrb.mxu0 %v2637_v58 }
 0x2d4   :  { %1522 = vmatpush.bf16.msra.mxu3 %v2665_v28 }
 0x2d5   :  { %1590 = vmatpush.bf16.msra.mxu2 %v2635_v54  ;;  %1603 = vmatpush.bf16.msrb.mxu0 %v2645_v5 }
 0x2d8   :  { %1523 = vmatpush.bf16.msra.mxu3 %v2688_v45 }
 0x2d9   :  { %1591 = vmatpush.bf16.msra.mxu2 %v2643_v4  ;;  %1604 = vmatpush.bf16.msrb.mxu0 %v2663_v25 }
 0x2dc   :  { %1524 = vmatpush.bf16.msra.mxu3 %v2696_v50 }
 0x2dd   :  { %1592 = vmatpush.bf16.msra.mxu2 %v2661_v18  ;;  %1605 = vmatpush.bf16.msrb.mxu0 %v2671_v29 }
 0x2e0   :  { %1525 = vmatpush.bf16.msra.mxu3 %v2702_v52 }
 0x2e1   :  { %1593 = vmatpush.bf16.msra.mxu2 %v2673_v35  ;;  %1606 = vmatpush.bf16.msrb.mxu0 %v2678_v38 }
 0x341   :  { %v1339_v24 = vpop.f32.mrf.mxu0 }
 0x342   :  { %v1383_v34 = vadd.f32 %v2860_v61, %v1339_v24 }
 0x346   :  { %v1313_v6 = vpop.f32.mrf.mxu3  ;;  %v1326_v17 = vpop.f32.mrf.mxu2 }
 0x347   :  { %v1343_v39 = vadd.f32 %v1313_v6, %v642_v56  ;;  %v1363_v55 = vadd.f32 %v1326_v17, %v3067_v31 }
 0x349   :  { %v2184_v51 = vmul.f32 -1.442695, %v1343_v39  ;;  %v2185_v16 = vmul.f32 -1.442695, %v1363_v55  ;;  %v1341_v1 = vpop.f32.mrf.mxu0 }
 0x34b   :  { %2326 = vpow2.f32 %v2184_v51 }
 0x34c   :  { %2328 = vpow2.f32 %v2185_v16 }
 0x34e   :  { %v1315_v20 = vpop.f32.mrf.mxu3  ;;  %v1328_v9 = vpop.f32.mrf.mxu2 }
 0x351   :  { %v2327_v30 = vpop.eup %2326 }
 0x352   :  { %v2329_v57 = vpop.eup %2328  ;;  %v1347_v21 = vadd.f32 1.0, %v2327_v30 }
 0x353   :  { %v1367_v22 = vadd.f32 1.0, %v2329_v57 }
 0x354   :  { %2330 = vrcp.f32 %v1347_v21  ;;  %v1359_v37 = vand.u32 2147483648, %v1347_v21  ;;  %v1357_v62 = vand.u32 2147483647, %v1347_v21  ;;  %vm1353_vm11 = vweird.f32 %v1347_v21 }
 0x355   :  { %2332 = vrcp.f32 %v1367_v22  ;;  %v1379_v41 = vand.u32 2147483648, %v1367_v22  ;;  %vm1373_vm15 = vweird.f32 %v1367_v22  ;;  %v1377_v56 = vand.u32 2147483647, %v1367_v22 }
 0x356   :  { %v1360_v7 = vor.u32 1.1754944e-38, %v1359_v37  ;;  %vm1358_vm13 = vcmp.eq.f32.partialorder %v1357_v62, 8.507059e+37 }
 0x357   :  { %v1380_v39 = vor.u32 1.1754944e-38, %v1379_v41  ;;  %vm1378_vm1 = vcmp.eq.f32.partialorder %v1377_v56, 8.507059e+37 }
 0x35a   :  { %v2331_v23 = vpop.eup %2330 }
 0x35b   :  { %v2333_v2 = vpop.eup %2332  ;;  %v1349_v60 = vmul.f32 %v2331_v23, %v1347_v21  ;;  %vm1354_vm10 = vweird.f32 %v2331_v23 }
 0x35c   :  { %v1369_v48 = vmul.f32 %v2333_v2, %v1367_v22  ;;  %vm1355_vm12 = vmor %vm1353_vm11, %vm1354_vm10  ;;  %vm1374_vm14 = vweird.f32 %v2333_v2 }
 0x35d   :  { %v1350_v40 = vsub.f32 1.0, %v1349_v60  ;;  %vm1375_vm0 = vmor %vm1373_vm15, %vm1374_vm14 }
 0x35e   :  { %v1370_v53 = vsub.f32 1.0, %v1369_v48 }
 0x35f   :  { %v1351_v13 = vmul.f32 %v2331_v23, %v1350_v40 }
 0x360   :  { %v1371_v36 = vmul.f32 %v2333_v2, %v1370_v53 }
 0x361   :  { %v1352_v46 = vadd.f32 %v2331_v23, %v1351_v13 }
 0x362   :  { %v1372_v11 = vadd.f32 %v2333_v2, %v1371_v36 }
 0x363   :  { %v1356_v8 = vsel %vm1355_vm12, %v2331_v23, %v1352_v46 }
 0x364   :  { %v1361_v59 = vsel %vm1358_vm13, %v1360_v7, %v1356_v8  ;;  %v1376_v17 = vsel %vm1375_vm0, %v2333_v2, %v1372_v11 }
 0x365   :  { %v1384_v3 = vmul.f32 %v1383_v34, %v1361_v59  ;;  %v1381_v31 = vsel %vm1378_vm1, %v1380_v39, %v1376_v17  ;;  %v3070_v34 = vld [vmem:[#allocation28_spill] sm:$0xff] }
 0x366   :  { %v1387_v55 = vsub.f32 1.0, %v1381_v31  ;;  %v1389_v16 = vmul.f32 %v1381_v31, %v2941_v47 }
 0x367   :  { %v1385_v6 = vadd.f32 %v1384_v3, %v2853_v0 }
 0x369   :  { %2334 = vtanh.f32 %v1385_v6 }
 0x36f   :  { %v2335_v51 = vpop.eup %2334 }
 0x370   :  { %v1388_v24 = vmul.f32 %v2335_v51, %v1387_v55  ;;  %v3071_v55 = vld [vmem:[#allocation18_spill] sm:$0xff]  ;;  %v3072_v51 = vld [vmem:[#allocation16_spill] sm:$0xff] }
 0x372   :  { %v2977_v1 = vadd.f32 %v1389_v16, %v1388_v24  ;;  %v647_v24 = vadd.f32 %v3072_v51, %v3071_v55 }
 0x374   :  { %v1397_v20 = vpack.c.bf16 %v2977_v1, %v2977_v1 }
 0x376   :  { %1406 = vmatmul.bf16.vlgmr.msrb.gmra.mxu1 %v1397_v20  ;;  %1419 = vmatmul.bf16.vlgmr.msrb.gmra.mxu3 %v1397_v20 }
 0x377   :  { %1432 = vmatmul.bf16.vlgmr.msrb.gmra.mxu2 %v1397_v20  ;;  %1612 = vmatpush.bf16.msrb.mxu1 %v2615_v33  ;;  %v3073_v20 = vld [vmem:[#allocation24_spill] sm:$0xff] }
 0x378   :  { %1680 = vmatpush.bf16.msrb.mxu3 %v2594_v10  ;;  %1693 = vmatpush.bf16.msrb.mxu2 %v2596_v14  ;;  %v3068_v14 = vld [vmem:[#allocation17_spill] sm:$0xff] }
 0x37b   :  { %1613 = vmatpush.bf16.msrb.mxu1 %v2630_v49 }
 0x37c   :  { %1681 = vmatpush.bf16.msrb.mxu3 %v2599_v15  ;;  %1694 = vmatpush.bf16.msrb.mxu2 %v2613_v32 }
 0x37f   :  { %1614 = vmatpush.bf16.msrb.mxu1 %v2640_v44 }
 0x380   :  { %1682 = vmatpush.bf16.msrb.mxu3 %v2611_v26  ;;  %1695 = vmatpush.bf16.msrb.mxu2 %v2622_v43 }
 0x383   :  { %1615 = vmatpush.bf16.msrb.mxu1 %v2655_v12 }
 0x384   :  { %1683 = vmatpush.bf16.msrb.mxu3 %v2620_v42  ;;  %1696 = vmatpush.bf16.msrb.mxu2 %v2637_v58  ;;  %v3069_v42 = vld [vmem:[#allocation23_spill] sm:$0xff] }
 0x387   :  { %1616 = vmatpush.bf16.msrb.mxu1 %v2665_v28 }
 0x388   :  { %1684 = vmatpush.bf16.msrb.mxu3 %v2635_v54  ;;  %1697 = vmatpush.bf16.msrb.mxu2 %v2645_v5 }
 0x38b   :  { %1617 = vmatpush.bf16.msrb.mxu1 %v2688_v45 }
 0x38c   :  { %1685 = vmatpush.bf16.msrb.mxu3 %v2643_v4  ;;  %1698 = vmatpush.bf16.msrb.mxu2 %v2663_v25 }
 0x38f   :  { %1618 = vmatpush.bf16.msrb.mxu1 %v2696_v50 }
 0x390   :  { %1686 = vmatpush.bf16.msrb.mxu3 %v2661_v18  ;;  %1699 = vmatpush.bf16.msrb.mxu2 %v2671_v29 }
 0x393   :  { %1619 = vmatpush.bf16.msrb.mxu1 %v2702_v52 }
 0x394   :  { %1687 = vmatpush.bf16.msrb.mxu3 %v2673_v35  ;;  %1700 = vmatpush.bf16.msrb.mxu2 %v2678_v38 }
 0x3f3   :  { %v1407_v10 = vpop.f32.mrf.mxu1 }
 0x3f4   :  { %v1437_v15 = vadd.f32 %v1407_v10, %v3068_v14 }
 0x3f6   :  { %v2186_v26 = vmul.f32 -1.442695, %v1437_v15 }
 0x3f8   :  { %2336 = vpow2.f32 %v2186_v26 }
 0x3f9   :  { %v1420_v32 = vpop.f32.mrf.mxu3 }
 0x3fa   :  { %v1457_v43 = vadd.f32 %v1420_v32, %v3069_v42  ;;  %v1433_v54 = vpop.f32.mrf.mxu2 }
 0x3fb   :  { %v1409_v58 = vpop.f32.mrf.mxu1  ;;  %v1477_v37 = vadd.f32 %v2860_v61, %v1433_v54 }
 0x3fc   :  { %v2187_v4 = vmul.f32 -1.442695, %v1457_v43 }
 0x3fe   :  { %v2337_v5 = vpop.eup %2336  ;;  %2338 = vpow2.f32 %v2187_v4 }
 0x3ff   :  { %v1441_v18 = vadd.f32 1.0, %v2337_v5 }
 0x401   :  { %2340 = vrcp.f32 %v1441_v18  ;;  %v1422_v25 = vpop.f32.mrf.mxu3  ;;  %v1453_v30 = vand.u32 2147483648, %v1441_v18  ;;  %v1451_v21 = vand.u32 2147483647, %v1441_v18  ;;  %vm1447_vm3 = vweird.f32 %v1441_v18 }
 0x402   :  { %v1435_v29 = vpop.f32.mrf.mxu2 }
 0x403   :  { %v1454_v60 = vor.u32 1.1754944e-38, %v1453_v30  ;;  %vm1452_vm5 = vcmp.eq.f32.partialorder %v1451_v21, 8.507059e+37 }
 0x404   :  { %v2339_v35 = vpop.eup %2338 }
 0x405   :  { %v1461_v0 = vadd.f32 1.0, %v2339_v35 }
 0x407   :  { %v2341_v38 = vpop.eup %2340  ;;  %2342 = vrcp.f32 %v1461_v0  ;;  %v1473_v62 = vand.u32 2147483648, %v1461_v0  ;;  %v1471_v46 = vand.u32 2147483647, %v1461_v0  ;;  %vm1467_vm7 = vweird.f32 %v1461_v0 }
 0x408   :  { %v1443_v47 = vmul.f32 %v2341_v38, %v1441_v18  ;;  %vm1448_vm2 = vweird.f32 %v2341_v38 }
 0x409   :  { %vm1449_vm4 = vmor %vm1447_vm3, %vm1448_vm2  ;;  %v1474_v59 = vor.u32 1.1754944e-38, %v1473_v62  ;;  %vm1472_vm9 = vcmp.eq.f32.partialorder %v1471_v46, 8.507059e+37 }
 0x40a   :  { %v1444_v9 = vsub.f32 1.0, %v1443_v47 }
 0x40c   :  { %v1445_v57 = vmul.f32 %v2341_v38, %v1444_v9 }
 0x40d   :  { %v2343_v22 = vpop.eup %2342 }
 0x40e   :  { %v1463_v23 = vmul.f32 %v2343_v22, %v1461_v0  ;;  %v1446_v2 = vadd.f32 %v2341_v38, %v1445_v57  ;;  %vm1468_vm6 = vweird.f32 %v2343_v22 }
 0x40f   :  { %vm1469_vm8 = vmor %vm1467_vm7, %vm1468_vm6 }
 0x410   :  { %v1464_v48 = vsub.f32 1.0, %v1463_v23  ;;  %v1450_v40 = vsel %vm1449_vm4, %v2341_v38, %v1446_v2 }
 0x411   :  { %v1455_v53 = vsel %vm1452_vm5, %v1454_v60, %v1450_v40 }
 0x412   :  { %v1465_v13 = vmul.f32 %v2343_v22, %v1464_v48  ;;  %v1478_v36 = vmul.f32 %v1477_v37, %v1455_v53 }
 0x414   :  { %v1466_v7 = vadd.f32 %v2343_v22, %v1465_v13  ;;  %v1479_v8 = vadd.f32 %v1478_v36, %v3070_v34 }
 0x416   :  { %v1470_v11 = vsel %vm1469_vm8, %v2343_v22, %v1466_v7  ;;  %2344 = vtanh.f32 %v1479_v8  ;;  %v3074_v7 = vld [vmem:[#allocation25_spill] sm:$0xff] }
 0x417   :  { %v1475_v3 = vsel %vm1472_vm9, %v1474_v59, %v1470_v11  ;;  %v3075_v11 = vld [vmem:[#allocation20_spill] sm:$0xff] }
 0x418   :  { %v1481_v41 = vsub.f32 1.0, %v1475_v3  ;;  %v1483_v17 = vmul.f32 %v1475_v3, %v2977_v1 }
 0x41c   :  { %v2345_v56 = vpop.eup %2344 }
 0x41d   :  { %v1482_v6 = vmul.f32 %v2345_v56, %v1481_v41 }
 0x41f   :  { %v3010_v39 = vadd.f32 %v1483_v17, %v1482_v6 }
 0x421   :  { %v1491_v31 = vpack.c.bf16 %v3010_v39, %v3010_v39 }
 0x423   :  { %1500 = vmatmul.bf16.vlgmr.msra.gmra.mxu0 %v1491_v31  ;;  %1513 = vmatmul.bf16.vlgmr.msra.gmra.mxu1 %v1491_v31 }
 0x424   :  { %1526 = vmatmul.bf16.vlgmr.msra.gmra.mxu3 %v1491_v31  ;;  %1706 = vmatpush.bf16.msra.mxu0 %v2615_v33 }
 0x428   :  { %1707 = vmatpush.bf16.msra.mxu0 %v2630_v49 }
 0x42c   :  { %1708 = vmatpush.bf16.msra.mxu0 %v2640_v44 }
 0x430   :  { %1709 = vmatpush.bf16.msra.mxu0 %v2655_v12 }
 0x434   :  { %1710 = vmatpush.bf16.msra.mxu0 %v2665_v28 }
 0x438   :  { %1711 = vmatpush.bf16.msra.mxu0 %v2688_v45 }
 0x43c   :  { %1712 = vmatpush.bf16.msra.mxu0 %v2696_v50 }
 0x440   :  { %1713 = vmatpush.bf16.msra.mxu0 %v2702_v52 }
 0x4a0   :  { %v1501_v16 = vpop.f32.mrf.mxu0  ;;  %v1514_v1 = vpop.f32.mrf.mxu1 }
 0x4a1   :  { %v1531_v33 = vadd.f32 %v1501_v16, %v647_v24  ;;  %v1551_v49 = vadd.f32 %v1514_v1, %v3073_v20 }
 0x4a3   :  { %v2188_v10 = vmul.f32 -1.442695, %v1531_v33  ;;  %v2189_v44 = vmul.f32 -1.442695, %v1551_v49 }
 0x4a5   :  { %2346 = vpow2.f32 %v2188_v10 }
 0x4a6   :  { %2348 = vpow2.f32 %v2189_v44 }
 0x4a7   :  { %v1527_v12 = vpop.f32.mrf.mxu3 }
 0x4a8   :  { %v1503_v28 = vpop.f32.mrf.mxu0  ;;  %v1516_v14 = vpop.f32.mrf.mxu1  ;;  %v1571_v47 = vadd.f32 %v2860_v61, %v1527_v12 }
 0x4ab   :  { %v2347_v45 = vpop.eup %2346 }
 0x4ac   :  { %v2349_v15 = vpop.eup %2348  ;;  %v1535_v50 = vadd.f32 1.0, %v2347_v45 }
 0x4ad   :  { %v1555_v26 = vadd.f32 1.0, %v2349_v15 }
 0x4ae   :  { %2350 = vrcp.f32 %v1535_v50  ;;  %v1547_v5 = vand.u32 2147483648, %v1535_v50  ;;  %v1545_v25 = vand.u32 2147483647, %v1535_v50  ;;  %vm1541_vm11 = vweird.f32 %v1535_v50 }
 0x4af   :  { %2352 = vrcp.f32 %v1555_v26  ;;  %v1529_v52 = vpop.f32.mrf.mxu3  ;;  %v1567_v57 = vand.u32 2147483648, %v1555_v26  ;;  %vm1561_vm15 = vweird.f32 %v1555_v26  ;;  %v1565_v22 = vand.u32 2147483647, %v1555_v26 }
 0x4b0   :  { %v1548_v0 = vor.u32 1.1754944e-38, %v1547_v5  ;;  %vm1546_vm13 = vcmp.eq.f32.partialorder %v1545_v25, 8.507059e+37 }
 0x4b1   :  { %v1568_v60 = vor.u32 1.1754944e-38, %v1567_v57  ;;  %vm1566_vm1 = vcmp.eq.f32.partialorder %v1565_v22, 8.507059e+37  ;;  %v3078_v22 = vld [vmem:[#allocation26_spill] sm:$0xff] }
 0x4b4   :  { %v2351_v32 = vpop.eup %2350 }
 0x4b5   :  { %v2353_v42 = vpop.eup %2352  ;;  %v1537_v43 = vmul.f32 %v2351_v32, %v1535_v50  ;;  %vm1542_vm10 = vweird.f32 %v2351_v32 }
 0x4b6   :  { %v1557_v54 = vmul.f32 %v2353_v42, %v1555_v26  ;;  %vm1543_vm12 = vmor %vm1541_vm11, %vm1542_vm10  ;;  %vm1562_vm14 = vweird.f32 %v2353_v42 }
 0x4b7   :  { %v1538_v58 = vsub.f32 1.0, %v1537_v43  ;;  %vm1563_vm0 = vmor %vm1561_vm15, %vm1562_vm14 }
 0x4b8   :  { %v1558_v4 = vsub.f32 1.0, %v1557_v54 }
 0x4b9   :  { %v1539_v18 = vmul.f32 %v2351_v32, %v1538_v58 }
 0x4ba   :  { %v1559_v29 = vmul.f32 %v2353_v42, %v1558_v4 }
 0x4bb   :  { %v1540_v35 = vadd.f32 %v2351_v32, %v1539_v18 }
 0x4bc   :  { %v1560_v9 = vadd.f32 %v2353_v42, %v1559_v29 }
 0x4bd   :  { %v1544_v38 = vsel %vm1543_vm12, %v2351_v32, %v1540_v35 }
 0x4be   :  { %v1549_v30 = vsel %vm1546_vm13, %v1548_v0, %v1544_v38  ;;  %v1564_v2 = vsel %vm1563_vm0, %v2353_v42, %v1560_v9 }
 0x4bf   :  { %v1572_v21 = vmul.f32 %v1571_v47, %v1549_v30  ;;  %v1569_v48 = vsel %vm1566_vm1, %v1568_v60, %v1564_v2  ;;  %v3076_v47 = vld [vmem:[#allocation21_spill] sm:$0xff] }
 0x4c0   :  { %v1575_v40 = vsub.f32 1.0, %v1569_v48  ;;  %v1577_v13 = vmul.f32 %v1569_v48, %v3010_v39 }
 0x4c1   :  { %v1573_v23 = vadd.f32 %v1572_v21, %v2863_v27 }
 0x4c3   :  { %2354 = vtanh.f32 %v1573_v23 }
 0x4c9   :  { %v2355_v37 = vpop.eup %2354 }
 0x4ca   :  { %v1576_v53 = vmul.f32 %v2355_v37, %v1575_v40 }
 0x4cc   :  { %v1578_v62 = vadd.f32 %v1577_v13, %v1576_v53 }
 0x4ce   :  { %v1585_v36 = vpack.c.bf16 %v1578_v62, %v1578_v62 }
 0x4d0   :  { %1594 = vmatmul.bf16.vlgmr.msra.gmra.mxu2 %v1585_v36  ;;  %1607 = vmatmul.bf16.vlgmr.msrb.gmra.mxu0 %v1585_v36 }
 0x4d1   :  { %1620 = vmatmul.bf16.vlgmr.msrb.gmra.mxu1 %v1585_v36 }
 0x54d   :  { %v1608_v46 = vpop.f32.mrf.mxu0 }
 0x54e   :  { %v1645_v34 = vadd.f32 %v1608_v46, %v3074_v7  ;;  %v1621_v8 = vpop.f32.mrf.mxu1 }
 0x54f   :  { %v1665_v15 = vadd.f32 %v2860_v61, %v1621_v8 }
 0x550   :  { %v2191_v27 = vmul.f32 -1.442695, %v1645_v34 }
 0x552   :  { %2356 = vpow2.f32 %v2191_v27 }
 0x553   :  { %v1595_v59 = vpop.f32.mrf.mxu2 }
 0x554   :  { %v1625_v3 = vadd.f32 %v1595_v59, %v3075_v11 }
 0x555   :  { %v1610_v41 = vpop.f32.mrf.mxu0 }
 0x556   :  { %v2190_v56 = vmul.f32 -1.442695, %v1625_v3  ;;  %v1623_v6 = vpop.f32.mrf.mxu1 }
 0x558   :  { %v2357_v17 = vpop.eup %2356  ;;  %2358 = vpow2.f32 %v2190_v56 }
 0x559   :  { %v1649_v39 = vadd.f32 1.0, %v2357_v17 }
 0x55b   :  { %v1597_v31 = vpop.f32.mrf.mxu2  ;;  %2360 = vrcp.f32 %v1649_v39  ;;  %v1661_v32 = vand.u32 2147483648, %v1649_v39  ;;  %vm1655_vm7 = vweird.f32 %v1649_v39  ;;  %v1659_v43 = vand.u32 2147483647, %v1649_v39 }
 0x55d   :  { %v1662_v4 = vor.u32 1.1754944e-38, %v1661_v32  ;;  %vm1660_vm9 = vcmp.eq.f32.partialorder %v1659_v43, 8.507059e+37 }
 0x55e   :  { %v2359_v55 = vpop.eup %2358 }
 0x55f   :  { %v1629_v51 = vadd.f32 1.0, %v2359_v55 }
 0x561   :  { %2362 = vrcp.f32 %v1629_v51  ;;  %v2361_v24 = vpop.eup %2360  ;;  %v1641_v10 = vand.u32 2147483648, %v1629_v51  ;;  %v1639_v12 = vand.u32 2147483647, %v1629_v51  ;;  %vm1635_vm3 = vweird.f32 %v1629_v51 }
 0x562   :  { %v1651_v16 = vmul.f32 %v2361_v24, %v1649_v39  ;;  %vm1656_vm6 = vweird.f32 %v2361_v24  ;;  %v2376_v39 = vld [vmem:[%s3052_s4] ss:$0 sm:$0xff]  ;;  %s2512_s4 = smov [#allocation11]  }
 0x563   :  { %v1642_v45 = vor.u32 1.1754944e-38, %v1641_v10  ;;  %vm1640_vm5 = vcmp.eq.f32.partialorder %v1639_v12, 8.507059e+37  ;;  %vm1657_vm8 = vmor %vm1655_vm7, %vm1656_vm6  ;;  %s1773_s15 = sshll.u32 %s2512_s4, 4  ;;  %s1774_s15 = int_to_ptr.vmem [resolvable:$true] %s1773_s15 }
 0x564   :  { %v1652_v20 = vsub.f32 1.0, %v1651_v16  ;;  %v3079_v16 = vld [vmem:[#allocation27_spill] sm:$0xff] }
 0x566   :  { %v1653_v28 = vmul.f32 %v2361_v24, %v1652_v20 }
 0x567   :  { %v2363_v1 = vpop.eup %2362 }
 0x568   :  { %v1631_v33 = vmul.f32 %v2363_v1, %v1629_v51  ;;  %vm1636_vm2 = vweird.f32 %v2363_v1  ;;  %v1654_v26 = vadd.f32 %v2361_v24, %v1653_v28 }
 0x569   :  { %vm1637_vm4 = vmor %vm1635_vm3, %vm1636_vm2 }
 0x56a   :  { %v1632_v49 = vsub.f32 1.0, %v1631_v33  ;;  %v1658_v58 = vsel %vm1657_vm8, %v2361_v24, %v1654_v26 }
 0x56b   :  { %v1663_v5 = vsel %vm1660_vm9, %v1662_v4, %v1658_v58 }
 0x56c   :  { %v1633_v44 = vmul.f32 %v2363_v1, %v1632_v49  ;;  %v1669_v18 = vsub.f32 1.0, %v1663_v5  ;;  %v1671_v29 = vmul.f32 %v1663_v5, %v1578_v62 }
 0x56e   :  { %v1634_v14 = vadd.f32 %v2363_v1, %v1633_v44 }
 0x570   :  { %v1638_v50 = vsel %vm1637_vm4, %v2363_v1, %v1634_v14  ;;  %v826_v1 = vadd.f32 %v2934_v19, %v3079_v16 }
 0x571   :  { %v1643_v52 = vsel %vm1640_vm5, %v1642_v45, %v1638_v50 }
 0x572   :  { %v1666_v42 = vmul.f32 %v1665_v15, %v1643_v52 }
 0x574   :  { %v1667_v54 = vadd.f32 %v1666_v42, %v2867_v63  ;;  %v3077_v63 = vld [vmem:[#allocation19_spill] sm:$0xff] }
 0x575   :  { %v652_v9 = vadd.f32 %v3077_v63, %v3076_v47 }
 0x576   :  { %2364 = vtanh.f32 %v1667_v54 }
 0x57c   :  { %v2365_v25 = vpop.eup %2364 }
 0x57d   :  { %v1670_v61 = vmul.f32 %v2365_v25, %v1669_v18 }
 0x57f   :  { %v3032_v35 = vadd.f32 %v1671_v29, %v1670_v61 }
 0x581   :  { %v1679_v0 = vpack.c.bf16 %v3032_v35, %v3032_v35 }
 0x583   :  { %1688 = vmatmul.bf16.vlgmr.msrb.gmra.mxu3 %v1679_v0  ;;  %1701 = vmatmul.bf16.vlgmr.msrb.gmra.mxu2 %v1679_v0 }
 0x584   :  { %1714 = vmatmul.bf16.vlgmr.msra.gmra.mxu0 %v1679_v0 }
 0x601   :  { %v1715_v38 = vpop.f32.mrf.mxu0 }
 0x602   :  { %v1759_v31 = vadd.f32 %v2376_v39, %v1715_v38 }
 0x606   :  { %v1689_v30 = vpop.f32.mrf.mxu3  ;;  %v1702_v57 = vpop.f32.mrf.mxu2 }
 0x607   :  { %v1719_v21 = vadd.f32 %v1689_v30, %v652_v9  ;;  %v1739_v23 = vadd.f32 %v1702_v57, %v3078_v22 }
 0x609   :  { %v2192_v2 = vmul.f32 -1.442695, %v1719_v21  ;;  %v2193_v60 = vmul.f32 -1.442695, %v1739_v23  ;;  %v1717_v48 = vpop.f32.mrf.mxu0 }
 0x60b   :  { %2366 = vpow2.f32 %v2192_v2 }
 0x60c   :  { %2368 = vpow2.f32 %v2193_v60 }
 0x60e   :  { %v1691_v40 = vpop.f32.mrf.mxu3  ;;  %v1704_v37 = vpop.f32.mrf.mxu2 }
 0x611   :  { %v2367_v53 = vpop.eup %2366 }
 0x612   :  { %v2369_v13 = vpop.eup %2368  ;;  %v1723_v62 = vadd.f32 1.0, %v2367_v53 }
 0x613   :  { %v1743_v36 = vadd.f32 1.0, %v2369_v13 }
 0x614   :  { %2370 = vrcp.f32 %v1723_v62  ;;  %v1735_v59 = vand.u32 2147483648, %v1723_v62  ;;  %v1733_v41 = vand.u32 2147483647, %v1723_v62  ;;  %vm1729_vm11 = vweird.f32 %v1723_v62 }
 0x615   :  { %2372 = vrcp.f32 %v1743_v36  ;;  %v1755_v33 = vand.u32 2147483648, %v1743_v36  ;;  %vm1749_vm15 = vweird.f32 %v1743_v36  ;;  %v1753_v49 = vand.u32 2147483647, %v1743_v36 }
 0x616   :  { %v1736_v17 = vor.u32 1.1754944e-38, %v1735_v59  ;;  %vm1734_vm13 = vcmp.eq.f32.partialorder %v1733_v41, 8.507059e+37 }
 0x617   :  { %v1756_v12 = vor.u32 1.1754944e-38, %v1755_v33  ;;  %vm1754_vm1 = vcmp.eq.f32.partialorder %v1753_v49, 8.507059e+37 }
 0x61a   :  { %v2371_v46 = vpop.eup %2370 }
 0x61b   :  { %v2373_v7 = vpop.eup %2372  ;;  %v1725_v34 = vmul.f32 %v2371_v46, %v1723_v62  ;;  %vm1730_vm10 = vweird.f32 %v2371_v46 }
 0x61c   :  { %v1745_v8 = vmul.f32 %v2373_v7, %v1743_v36  ;;  %vm1731_vm12 = vmor %vm1729_vm11, %vm1730_vm10  ;;  %vm1750_vm14 = vweird.f32 %v2373_v7 }
 0x61d   :  { %v1726_v27 = vsub.f32 1.0, %v1725_v34  ;;  %vm1751_vm0 = vmor %vm1749_vm15, %vm1750_vm14 }
 0x61e   :  { %v1746_v11 = vsub.f32 1.0, %v1745_v8 }
 0x61f   :  { %v1727_v3 = vmul.f32 %v2371_v46, %v1726_v27 }
 0x620   :  { %v1747_v56 = vmul.f32 %v2373_v7, %v1746_v11 }
 0x621   :  { %v1728_v6 = vadd.f32 %v2371_v46, %v1727_v3 }
 0x622   :  { %v1748_v24 = vadd.f32 %v2373_v7, %v1747_v56 }
 0x623   :  { %v1732_v55 = vsel %vm1731_vm12, %v2371_v46, %v1728_v6 }
 0x624   :  { %v1737_v51 = vsel %vm1734_vm13, %v1736_v17, %v1732_v55  ;;  %v1752_v44 = vsel %vm1751_vm0, %v2373_v7, %v1748_v24 }
 0x625   :  { %v1760_v20 = vmul.f32 %v1759_v31, %v1737_v51  ;;  %v1757_v28 = vsel %vm1754_vm1, %v1756_v12, %v1752_v44 }
 0x626   :  { %v1763_v14 = vsub.f32 1.0, %v1757_v28  ;;  %v1765_v15 = vmul.f32 %v1757_v28, %v3032_v35 }
 0x627   :  { %v1761_v10 = vadd.f32 %v1760_v20, %v826_v1 }
 0x629   :  { %2374 = vtanh.f32 %v1761_v10 }
 0x62f   :  { %v2375_v45 = vpop.eup %2374 }
 0x630   :  { %v1764_v19 = vmul.f32 %v2375_v45, %v1763_v14 }
 0x632   :  { %v1766_v50 = vadd.f32 %v1765_v15, %v1764_v19 }
 0x634   :  { %1767 = vst [vmem:[#allocation11] sm:$0xff] %v1766_v50 }
 0x635   :  { %1778 = dma.vmem_to_hbm [thread:$0]  %s1774_s15, 128, %s1776_s18, [#allocation5]  }
 0x636   :  { %2503 = dma.done.wait [#allocation5], 128  }
 0x637   :  { %2504 = vsyncadd [#allocation5], 4294967168 }
 0x638   :  { %1783 = vsyncpa [#allocation4], 1 }
 0x639   :  { %1784 = vsyncpa [#allocation7], 1 }
 0x63a   :  { %1785 = vsyncpa [#allocation10], 1 }
 0x63b   :  { %1786 = vsyncpa [#allocation5], 1 }

</bundles_post_ra>
